<compile_context>
chip_gen: v6e
topology: v6e:2x2x1
jax: 0.10.0
libtpu: 0.0.40
codegen_flags: <defaults>
</compile_context>

<pallas_src>
import jax
import jax.numpy as jnp
from jax import lax
from jax.experimental import pallas as pl
from jax.experimental.pallas import tpu as pltpu


def lld_kernel(x_ref, mask_ref,
               wfsl_ref, bfsl_ref,
               wih_ref, whh_ref, blstm_ref,
               wpkf_ref, wpkb_ref, battn_ref,
               out_ref,
               zf_scr, zb_scr, hf_scr, hb_scr):
    """One batch tile. x_ref: (T, BT, D) time-major. out_ref: (BT, 128)."""
    T, BT, D = x_ref.shape
    H = hf_scr.shape[-1]
    G = 4 * H                      # per-direction gate width (128 for H=32)
    PW = out_ref.shape[-1]         # packed attention/output width (128)

    def mm(a, w_ref):
        w = w_ref[...]
        # cast activations to the weight dtype (bf16 fast path), accumulate f32
        return jnp.dot(a.astype(w.dtype), w, preferred_element_type=jnp.float32)

    # ---- fsl + ReLU over the whole tile (dropout d1 identity) ----
    x2 = x_ref[...].reshape(T * BT, D)
    h1 = jnp.maximum(mm(x2, wfsl_ref) + bfsl_ref[...], 0.0)       # (T*BT, H)

    # ---- ONE fused hoisted LSTM input projection for both directions ----
    z_all = mm(h1, wih_ref) + blstm_ref[...]                       # (T*BT, 8H)
    zf_scr[...] = z_all[:, :G].reshape(T, BT, G)
    zb_scr[...] = z_all[:, G:].reshape(T, BT, G)

    whh = whh_ref[...]             # (2H, 8H) block-diagonal, kept f32

    def gates(zd, c):
        # per-direction gate column order is [i | f | o | g]:
        # one near-full-width sigmoid + one tanh, slice afterwards.
        sig = jax.nn.sigmoid(zd[:, :3 * H])
        g = jnp.tanh(zd[:, 3 * H:])
        i, f, o = sig[:, :H], sig[:, H:2 * H], sig[:, 2 * H:3 * H]
        c_new = f * c + i * g
        h_new = o * jnp.tanh(c_new)
        return h_new, c_new

    # ---- fused fwd/bwd recurrence (dropout d2 identity) ----
    def step(k, carry):
        h_cat, c_f, c_b = carry
        r = T - 1 - k
        z = jnp.concatenate([zf_scr[k], zb_scr[r]], axis=-1)       # (BT, 8H)
        z = z + jnp.dot(h_cat, whh, preferred_element_type=jnp.float32)
        h_f, c_f = gates(z[:, :G], c_f)
        h_b, c_b = gates(z[:, G:], c_b)
        hf_scr[k] = h_f
        hb_scr[r] = h_b
        return jnp.concatenate([h_f, h_b], axis=-1), c_f, c_b

    zH = jnp.zeros((BT, H), jnp.float32)
    z2H = jnp.zeros((BT, 2 * H), jnp.float32)
    lax.fori_loop(0, T, step, (z2H, zH, zH), unroll=True)

    # ---- packed attention-score + output-projection matmul (d3 identity) ----
    # columns: [attn score | 4 output logits | zero padding]
    proj = (mm(hf_scr[...].reshape(T * BT, H), wpkf_ref)
            + mm(hb_scr[...].reshape(T * BT, H), wpkb_ref))        # (T*BT, PW)
    proj = proj.reshape(T, BT, PW)

    # ---- masked softmax over time + pooling (static T, short chains) ----
    # (torch semantics: masked logits become 0, not -inf)
    # For large T these chains should be lane-packed (time on the lane axis).
    b_a = battn_ref[0]
    s = [(proj[t, :, 0:1] + b_a) * mask_ref[t] for t in range(T)]  # (BT, 1)
    m = s[0]
    for t in range(1, T):
        m = jnp.maximum(m, s[t])
    e = [jnp.exp(st - m) for st in s]
    denom = e[0]
    for t in range(1, T):
        denom = denom + e[t]
    # pooled@W_out == sum_t alpha_t * (h_t@W_out): pool the packed projections
    acc = e[0] * proj[0]
    for t in range(1, T):
        acc = acc + e[t] * proj[t]

    out_ref[...] = acc * (1.0 / denom)       # lane-dense (BT, 128) store


def _round_up(a, m):
    return (a + m - 1) // m * m


def _cdiv(a, b):
    return (a + b - 1) // b


def _reorder_cols(w_t, H):
    # torch gate column order [i|f|g|o] -> kernel order [i|f|o|g]
    return jnp.concatenate(
        [w_t[:, 0:H], w_t[:, H:2 * H], w_t[:, 3 * H:4 * H], w_t[:, 2 * H:3 * H]],
        axis=1)


def _reorder_vec(b, H):
    return jnp.concatenate([b[0:H], b[H:2 * H], b[3 * H:4 * H], b[2 * H:3 * H]])


def lld_blstm_attn_forward(x, mask, params, *, batch_tile=128,
                           num_core_tiles=1, use_bf16_matmul=True):
    """x: (B, T, D); mask: (B, T).  Returns (B, 4) float32."""
    B, T, D = x.shape
    p = params
    H = p['fsl_w'].shape[0]
    PW = 128

    # bf16 weights/activation casts for the non-recurrent matmuls (MXU native
    # on all generations); the recurrent whh stays f32 so error does not
    # compound through the recurrence; all element-wise gate math is f32.
    wdt = jnp.bfloat16 if use_bf16_matmul else jnp.float32

    # -- one-time weight re-layout from PyTorch conventions (outside kernel) --
    wfsl = p['fsl_w'].T.astype(wdt)                                  # (D, H)
    bfsl = p['fsl_b'].reshape(1, H).astype(jnp.float32)

    wih_f_r = _reorder_cols(p['w_ih_f'].T, H)                        # (D, 4H)
    wih_b_r = _reorder_cols(p['w_ih_b'].T, H)
    wih_cat = jnp.concatenate([wih_f_r, wih_b_r], axis=1).astype(wdt)  # (D, 8H)

    whh_f_r = _reorder_cols(p['w_hh_f'].T, H).astype(jnp.float32)    # (H, 4H)
    whh_b_r = _reorder_cols(p['w_hh_b'].T, H).astype(jnp.float32)
    zH4H = jnp.zeros((H, 4 * H), jnp.float32)
    whh_blk = jnp.concatenate(
        [jnp.concatenate([whh_f_r, zH4H], axis=1),
         jnp.concatenate([zH4H, whh_b_r], axis=1)], axis=0)          # (2H, 8H)

    b_f = _reorder_vec(p['b_ih_f'] + p['b_hh_f'], H)
    b_b = _reorder_vec(p['b_ih_b'] + p['b_hh_b'], H)
    b_cat = jnp.concatenate([b_f, b_b]).reshape(1, 8 * H).astype(jnp.float32)

    # packed [attn | out] weights, one per direction, padded to 128 lanes
    wpack_f = jnp.zeros((H, PW), jnp.float32)
    wpack_f = wpack_f.at[:, 0].set(p['attn_w'][0, :H])
    wpack_f = wpack_f.at[:, 1:5].set(p['out_w'][:, :H].T).astype(wdt)
    wpack_b = jnp.zeros((H, PW), jnp.float32)
    wpack_b = wpack_b.at[:, 0].set(p['attn_w'][0, H:])
    wpack_b = wpack_b.at[:, 1:5].set(p['out_w'][:, H:].T).astype(wdt)

    battn = p['attn_b'].reshape(1).astype(jnp.float32)               # SMEM scalar
    bout = p['out_b'].reshape(1, 4).astype(jnp.float32)

    # -- batch tiling: BT rows per grid step (multiple of 8 for sublanes) --
    BT = _round_up(min(_round_up(B, 8), batch_tile), 8)
    if num_core_tiles > 1:        # v7x: force >=2 grid tiles so both TCs work
        BT = min(BT, max(8, _round_up(_cdiv(_round_up(B, 8), num_core_tiles), 8)))
    B_pad = _round_up(B, BT)
    n_tiles = B_pad // BT

    # time-major layout for the recurrence; zero-pad the batch
    xT = jnp.transpose(x.astype(jnp.float32), (1, 0, 2))             # (T, B, D)
    maskT = jnp.transpose(mask.astype(jnp.float32), (1, 0))[:, :, None]
    if B_pad != B:
        xT = jnp.pad(xT, ((0, 0), (0, B_pad - B), (0, 0)))
        maskT = jnp.pad(maskT, ((0, 0), (0, B_pad - B), (0, 0)))

    def full_spec(a):
        n = a.ndim
        return pl.BlockSpec(a.shape, lambda b, _n=n: (0,) * _n)

    in_specs = [
        pl.BlockSpec((T, BT, D), lambda b: (0, b, 0)),    # x (time-major)
        pl.BlockSpec((T, BT, 1), lambda b: (0, b, 0)),    # mask (time-major)
        full_spec(wfsl), full_spec(bfsl),
        full_spec(wih_cat), full_spec(whh_blk), full_spec(b_cat),
        full_spec(wpack_f), full_spec(wpack_b),
        pl.BlockSpec(memory_space=pltpu.MemorySpace.SMEM),   # battn scalar
    ]

    out = pl.pallas_call(
        lld_kernel,
        out_shape=jax.ShapeDtypeStruct((B_pad, PW), jnp.float32),
        grid=(n_tiles,),
        in_specs=in_specs,
        out_specs=pl.BlockSpec((BT, PW), lambda b: (b, 0)),
        scratch_shapes=[
            pltpu.VMEM((T, BT, 4 * H), jnp.float32),   # hoisted z_in, fwd
            pltpu.VMEM((T, BT, 4 * H), jnp.float32),   # hoisted z_in, bwd
            pltpu.VMEM((T, BT, H), jnp.float32),       # h fwd, time-major
            pltpu.VMEM((T, BT, H), jnp.float32),       # h bwd, time-major
        ],
        compiler_params=pltpu.CompilerParams(
            dimension_semantics=("parallel",),
            vmem_limit_bytes=32 * 1024 * 1024),
    )(xT, maskT,
      wfsl, bfsl,
      wih_cat, whh_blk, b_cat,
      wpack_f, wpack_b, battn)

    # cols 1:5 of the lane-dense block are the 4 logits; add the output bias
    return out[:B, 1:5] + bout


def init_params(key, input_dim=32, hidden_dim=32):
    """Deterministic synthetic parameters in PyTorch layout conventions.

    Note: the PyTorch module sets LSTM input_size=input_dim while feeding it
    the fsl output (hidden_dim wide), so it only works when
    input_dim == hidden_dim (true for the defaults), same here.
    """
    D, H = input_dim, hidden_dim
    ks = jax.random.split(key, 14)

    def u(k, shape, scale=0.1):
        return jax.random.uniform(k, shape, jnp.float32, -1.0, 1.0) * scale

    return dict(
        fsl_w=u(ks[0], (H, D)),       fsl_b=u(ks[1], (H,)),          # Linear
        w_ih_f=u(ks[2], (4 * H, D)),  w_hh_f=u(ks[3], (4 * H, H)),   # LSTM fwd
        b_ih_f=u(ks[4], (4 * H,)),    b_hh_f=u(ks[5], (4 * H,)),
        w_ih_b=u(ks[6], (4 * H, D)),  w_hh_b=u(ks[7], (4 * H, H)),   # LSTM rev
        b_ih_b=u(ks[8], (4 * H,)),    b_hh_b=u(ks[9], (4 * H,)),
        attn_w=u(ks[10], (1, 2 * H)), attn_b=u(ks[11], (1,)),        # attn
        out_w=u(ks[12], (4, 2 * H)),  out_b=u(ks[13], (4,)),         # output
    )


def lld_reference(x, mask, p):
    """Pure-JAX reference mirroring the PyTorch module in inference mode."""
    H = p['fsl_w'].shape[0]
    x = x.astype(jnp.float32)
    mask = mask.astype(jnp.float32)
    h1 = jax.nn.relu(jnp.einsum('btd,hd->bth', x, p['fsl_w']) + p['fsl_b'])
    B, T, _ = h1.shape

    def direction(w_ih, w_hh, b_ih, b_hh, reverse):
        wih_t, whh_t = w_ih.T, w_hh.T
        b = b_ih + b_hh
        h = jnp.zeros((B, H), jnp.float32)
        c = jnp.zeros((B, H), jnp.float32)
        outs = [None] * T
        order = range(T - 1, -1, -1) if reverse else range(T)
        for t in order:
            z = h1[:, t, :] @ wih_t + h @ whh_t + b
            i = jax.nn.sigmoid(z[:, :H])
            f = jax.nn.sigmoid(z[:, H:2 * H])
            g = jnp.tanh(z[:, 2 * H:3 * H])
            o = jax.nn.sigmoid(z[:, 3 * H:4 * H])
            c = f * c + i * g
            h = o * jnp.tanh(c)
            outs[t] = h
        return jnp.stack(outs, axis=1)                      # (B, T, H)

    hf = direction(p['w_ih_f'], p['w_hh_f'], p['b_ih_f'], p['b_hh_f'], False)
    hb = direction(p['w_ih_b'], p['w_hh_b'], p['b_ih_b'], p['b_hh_b'], True)
    h2 = jnp.concatenate([hf, hb], axis=-1)                 # (B, T, 2H)
    a = jnp.einsum('bth,h->bt', h2, p['attn_w'][0]) + p['attn_b']
    alpha = jax.nn.softmax(a * mask, axis=1)[..., None]
    pooled = jnp.sum(h2 * alpha, axis=1)
    return pooled @ p['out_w'].T + p['out_b']


if __name__ == "__main__":
    key = jax.random.PRNGKey(0)
    kx, km, kp = jax.random.split(key, 3)

    B, T, D, H = 2, 8, 32, 32
    x = jax.random.normal(kx, (B, T, D), jnp.float32)
    mask = (jax.random.uniform(km, (B, T)) > 0.2).astype(jnp.float32)
    params = init_params(kp, input_dim=D, hidden_dim=H)

    ref = lld_reference(x, mask, params)

    # exact-ish f32 path
    fwd_f32 = jax.jit(lambda a, m, p:
                      lld_blstm_attn_forward(a, m, p, use_bf16_matmul=False))
    out = fwd_f32(x, mask, params)
    jax.block_until_ready(out)
    assert out.shape == (B, 4)
    err = float(jnp.max(jnp.abs(out - ref)))
    assert err < 1e-3, f"f32 kernel/reference mismatch: max|diff|={err}"

    # bf16 MXU fast path (non-recurrent matmuls only); looser tolerance
    fwd_bf16 = jax.jit(lambda a, m, p:
                       lld_blstm_attn_forward(a, m, p, use_bf16_matmul=True))
    out_bf16 = fwd_bf16(x, mask, params)
    jax.block_until_ready(out_bf16)
    err_bf16 = float(jnp.max(jnp.abs(out_bf16 - ref)))
    assert err_bf16 < 5e-2, f"bf16 kernel/reference mismatch: max|diff|={err_bf16}"

    print("KERNEL_OK")
</pallas_src>

<mosaic_0001>
module attributes {stable_mosaic.version = 11 : i64} {
  func.func @lld_kernel(%arg0: i32, %arg1: memref<8x8x32xf32, #tpu.memory_space<vmem>>, %arg2: memref<8x8x1xf32, #tpu.memory_space<vmem>>, %arg3: memref<32x32xf32, #tpu.memory_space<vmem>>, %arg4: memref<1x32xf32, #tpu.memory_space<vmem>>, %arg5: memref<32x256xf32, #tpu.memory_space<vmem>>, %arg6: memref<64x256xf32, #tpu.memory_space<vmem>>, %arg7: memref<1x256xf32, #tpu.memory_space<vmem>>, %arg8: memref<32x128xf32, #tpu.memory_space<vmem>>, %arg9: memref<32x128xf32, #tpu.memory_space<vmem>>, %arg10: memref<1xf32, #tpu.memory_space<smem>>, %arg11: memref<8x128xf32, #tpu.memory_space<vmem>>, %arg12: memref<8x8x128xf32, #tpu.memory_space<vmem>>, %arg13: memref<8x8x128xf32, #tpu.memory_space<vmem>>, %arg14: memref<8x8x32xf32, #tpu.memory_space<vmem>>, %arg15: memref<8x8x32xf32, #tpu.memory_space<vmem>>) attributes {dimension_semantics = [#tpu.dimension_semantics<parallel>], iteration_bounds = array<i64: 1>, scalar_prefetch = 0 : i64, scratch_operands = 4 : i64, tpu.core_type = #tpu.core_type<tc>, window_params = [{transform_indices = @transform_0, window_bounds = array<i64: 8, 8, 32>}, {transform_indices = @transform_1, window_bounds = array<i64: 8, 8, 1>}, {pipeline_mode = #tpu.pipeline_mode<synchronous>, transform_indices = @transform_2, window_bounds = array<i64: 32, 32>}, {pipeline_mode = #tpu.pipeline_mode<synchronous>, transform_indices = @transform_3, window_bounds = array<i64: 1, 32>}, {pipeline_mode = #tpu.pipeline_mode<synchronous>, transform_indices = @transform_4, window_bounds = array<i64: 32, 256>}, {pipeline_mode = #tpu.pipeline_mode<synchronous>, transform_indices = @transform_5, window_bounds = array<i64: 64, 256>}, {pipeline_mode = #tpu.pipeline_mode<synchronous>, transform_indices = @transform_6, window_bounds = array<i64: 1, 256>}, {pipeline_mode = #tpu.pipeline_mode<synchronous>, transform_indices = @transform_7, window_bounds = array<i64: 32, 128>}, {pipeline_mode = #tpu.pipeline_mode<synchronous>, transform_indices = @transform_8, window_bounds = array<i64: 32, 128>}, {transform_indices = @transform_9, window_bounds = array<i64: 1>}, {transform_indices = @transform_10, window_bounds = array<i64: 8, 128>}]} {
    %c0 = arith.constant 0 : index
    %c0_0 = arith.constant 0 : index
    %c0_1 = arith.constant 0 : index
    %0 = vector.load %arg1[%c0, %c0_0, %c0_1] : memref<8x8x32xf32, #tpu.memory_space<vmem>>, vector<8x8x32xf32>
    %1 = vector.shape_cast %0 : vector<8x8x32xf32> to vector<64x32xf32>
    %c0_2 = arith.constant 0 : index
    %c0_3 = arith.constant 0 : index
    %2 = vector.load %arg3[%c0_2, %c0_3] : memref<32x32xf32, #tpu.memory_space<vmem>>, vector<32x32xf32>
    %cst = arith.constant dense<0.000000e+00> : vector<64x32xf32>
    %3 = tpu.matmul %1, %2, %cst {dimension_numbers = #tpu.dot_dimension_numbers<[1], [0], [0], [1], [0, 0, 1, 1], [], []>} : vector<64x32xf32>, vector<32x32xf32>, vector<64x32xf32> -> vector<64x32xf32>
    %c0_4 = arith.constant 0 : index
    %c0_5 = arith.constant 0 : index
    %4 = vector.load %arg4[%c0_4, %c0_5] : memref<1x32xf32, #tpu.memory_space<vmem>>, vector<1x32xf32>
    %5 = vector.broadcast %4 : vector<1x32xf32> to vector<64x32xf32>
    %6 = arith.addf %3, %5 : vector<64x32xf32>
    %cst_6 = arith.constant 0.000000e+00 : f32
    %7 = vector.broadcast %cst_6 : f32 to vector<64x32xf32>
    %8 = arith.maximumf %6, %7 : vector<64x32xf32>
    %c0_7 = arith.constant 0 : index
    %c0_8 = arith.constant 0 : index
    %9 = vector.load %arg5[%c0_7, %c0_8] : memref<32x256xf32, #tpu.memory_space<vmem>>, vector<32x256xf32>
    %cst_9 = arith.constant dense<0.000000e+00> : vector<64x256xf32>
    %10 = tpu.matmul %8, %9, %cst_9 {dimension_numbers = #tpu.dot_dimension_numbers<[1], [0], [0], [1], [0, 0, 1, 1], [], []>} : vector<64x32xf32>, vector<32x256xf32>, vector<64x256xf32> -> vector<64x256xf32>
    %c0_10 = arith.constant 0 : index
    %c0_11 = arith.constant 0 : index
    %11 = vector.load %arg7[%c0_10, %c0_11] : memref<1x256xf32, #tpu.memory_space<vmem>>, vector<1x256xf32>
    %12 = vector.broadcast %11 : vector<1x256xf32> to vector<64x256xf32>
    %13 = arith.addf %10, %12 : vector<64x256xf32>
    %14 = vector.extract_strided_slice %13 {offsets = [0, 0], sizes = [64, 128], strides = [1, 1]} : vector<64x256xf32> to vector<64x128xf32>
    %15 = vector.shape_cast %14 : vector<64x128xf32> to vector<8x8x128xf32>
    %c0_12 = arith.constant 0 : index
    %c0_13 = arith.constant 0 : index
    %c0_14 = arith.constant 0 : index
    %16 = vector.load %arg12[%c0_12, %c0_13, %c0_14] : memref<8x8x128xf32, #tpu.memory_space<vmem>>, vector<8x8x128xf32>
    tpu.vector_store %arg12[%c0_12, %c0_13, %c0_14], %15 {strides = array<i32>} : memref<8x8x128xf32, #tpu.memory_space<vmem>>, vector<8x8x128xf32>,
    %17 = vector.extract_strided_slice %13 {offsets = [0, 128], sizes = [64, 128], strides = [1, 1]} : vector<64x256xf32> to vector<64x128xf32>
    %18 = vector.shape_cast %17 : vector<64x128xf32> to vector<8x8x128xf32>
    %c0_15 = arith.constant 0 : index
    %c0_16 = arith.constant 0 : index
    %c0_17 = arith.constant 0 : index
    %19 = vector.load %arg13[%c0_15, %c0_16, %c0_17] : memref<8x8x128xf32, #tpu.memory_space<vmem>>, vector<8x8x128xf32>
    tpu.vector_store %arg13[%c0_15, %c0_16, %c0_17], %18 {strides = array<i32>} : memref<8x8x128xf32, #tpu.memory_space<vmem>>, vector<8x8x128xf32>,
    %c0_18 = arith.constant 0 : index
    %c0_19 = arith.constant 0 : index
    %20 = vector.load %arg6[%c0_18, %c0_19] : memref<64x256xf32, #tpu.memory_space<vmem>>, vector<64x256xf32>
    %cst_20 = arith.constant 0.000000e+00 : f32
    %21 = vector.broadcast %cst_20 : f32 to vector<8x32xf32>
    %cst_21 = arith.constant 0.000000e+00 : f32
    %22 = vector.broadcast %cst_21 : f32 to vector<8x64xf32>
    %c0_i32 = arith.constant 0 : i32
    %c7_i32 = arith.constant 7 : i32
    %23 = arith.subi %c7_i32, %c0_i32 : i32
    %24 = arith.index_cast %c0_i32 : i32 to index
    %c0_22 = arith.constant 0 : index
    %c0_23 = arith.constant 0 : index
    %25 = vector.load %arg12[%24, %c0_22, %c0_23] : memref<8x8x128xf32, #tpu.memory_space<vmem>>, vector<1x8x128xf32>
    %26 = vector.shape_cast %25 : vector<1x8x128xf32> to vector<8x128xf32>
    %27 = arith.index_cast %23 : i32 to index
    %c0_24 = arith.constant 0 : index
    %c0_25 = arith.constant 0 : index
    %28 = vector.load %arg13[%27, %c0_24, %c0_25] : memref<8x8x128xf32, #tpu.memory_space<vmem>>, vector<1x8x128xf32>
    %29 = vector.shape_cast %28 : vector<1x8x128xf32> to vector<8x128xf32>
    %30 = tpu.concatenate %26, %29 in 1 : vector<8x128xf32>, vector<8x128xf32> -> vector<8x256xf32>
    %cst_26 = arith.constant dense<0.000000e+00> : vector<8x256xf32>
    %31 = tpu.matmul %22, %20, %cst_26 {dimension_numbers = #tpu.dot_dimension_numbers<[1], [0], [0], [1], [0, 0, 1, 1], [], []>} : vector<8x64xf32>, vector<64x256xf32>, vector<8x256xf32> -> vector<8x256xf32>
    %32 = arith.addf %30, %31 : vector<8x256xf32>
    %33 = vector.extract_strided_slice %32 {offsets = [0, 0], sizes = [8, 128], strides = [1, 1]} : vector<8x256xf32> to vector<8x128xf32>
    %34 = vector.extract_strided_slice %33 {offsets = [0, 0], sizes = [8, 96], strides = [1, 1]} : vector<8x128xf32> to vector<8x96xf32>
    %35 = arith.negf %34 : vector<8x96xf32>
    %36 = math.exp %35 : vector<8x96xf32>
    %cst_27 = arith.constant 1.000000e+00 : f32
    %37 = vector.broadcast %cst_27 : f32 to vector<8x96xf32>
    %38 = arith.addf %37, %36 : vector<8x96xf32>
    %39 = arith.divf %37, %38 : vector<8x96xf32>
    %40 = vector.extract_strided_slice %33 {offsets = [0, 96], sizes = [8, 32], strides = [1, 1]} : vector<8x128xf32> to vector<8x32xf32>
    %41 = math.tanh %40 : vector<8x32xf32>
    %42 = vector.extract_strided_slice %39 {offsets = [0, 0], sizes = [8, 32], strides = [1, 1]} : vector<8x96xf32> to vector<8x32xf32>
    %43 = vector.extract_strided_slice %39 {offsets = [0, 32], sizes = [8, 32], strides = [1, 1]} : vector<8x96xf32> to vector<8x32xf32>
    %44 = vector.extract_strided_slice %39 {offsets = [0, 64], sizes = [8, 32], strides = [1, 1]} : vector<8x96xf32> to vector<8x32xf32>
    %45 = arith.mulf %43, %21 : vector<8x32xf32>
    %46 = arith.mulf %42, %41 : vector<8x32xf32>
    %47 = arith.addf %45, %46 : vector<8x32xf32>
    %48 = math.tanh %47 : vector<8x32xf32>
    %49 = arith.mulf %44, %48 : vector<8x32xf32>
    %50 = vector.extract_strided_slice %32 {offsets = [0, 128], sizes = [8, 128], strides = [1, 1]} : vector<8x256xf32> to vector<8x128xf32>
    %51 = vector.extract_strided_slice %50 {offsets = [0, 0], sizes = [8, 96], strides = [1, 1]} : vector<8x128xf32> to vector<8x96xf32>
    %52 = arith.negf %51 : vector<8x96xf32>
    %53 = math.exp %52 : vector<8x96xf32>
    %cst_28 = arith.constant 1.000000e+00 : f32
    %54 = vector.broadcast %cst_28 : f32 to vector<8x96xf32>
    %55 = arith.addf %54, %53 : vector<8x96xf32>
    %56 = arith.divf %54, %55 : vector<8x96xf32>
    %57 = vector.extract_strided_slice %50 {offsets = [0, 96], sizes = [8, 32], strides = [1, 1]} : vector<8x128xf32> to vector<8x32xf32>
    %58 = math.tanh %57 : vector<8x32xf32>
    %59 = vector.extract_strided_slice %56 {offsets = [0, 0], sizes = [8, 32], strides = [1, 1]} : vector<8x96xf32> to vector<8x32xf32>
    %60 = vector.extract_strided_slice %56 {offsets = [0, 32], sizes = [8, 32], strides = [1, 1]} : vector<8x96xf32> to vector<8x32xf32>
    %61 = vector.extract_strided_slice %56 {offsets = [0, 64], sizes = [8, 32], strides = [1, 1]} : vector<8x96xf32> to vector<8x32xf32>
    %62 = arith.mulf %60, %21 : vector<8x32xf32>
    %63 = arith.mulf %59, %58 : vector<8x32xf32>
    %64 = arith.addf %62, %63 : vector<8x32xf32>
    %65 = math.tanh %64 : vector<8x32xf32>
    %66 = arith.mulf %61, %65 : vector<8x32xf32>
    %67 = arith.index_cast %c0_i32 : i32 to index
    %c0_29 = arith.constant 0 : index
    %c0_30 = arith.constant 0 : index
    %68 = vector.load %arg14[%67, %c0_29, %c0_30] : memref<8x8x32xf32, #tpu.memory_space<vmem>>, vector<1x8x32xf32>
    %69 = vector.shape_cast %68 : vector<1x8x32xf32> to vector<8x32xf32>
    %70 = vector.shape_cast %49 : vector<8x32xf32> to vector<1x8x32xf32>
    tpu.vector_store %arg14[%67, %c0_29, %c0_30], %70 {strides = array<i32>} : memref<8x8x32xf32, #tpu.memory_space<vmem>>, vector<1x8x32xf32>,
    %71 = arith.index_cast %23 : i32 to index
    %c0_31 = arith.constant 0 : index
    %c0_32 = arith.constant 0 : index
    %72 = vector.load %arg15[%71, %c0_31, %c0_32] : memref<8x8x32xf32, #tpu.memory_space<vmem>>, vector<1x8x32xf32>
    %73 = vector.shape_cast %72 : vector<1x8x32xf32> to vector<8x32xf32>
    %74 = vector.shape_cast %66 : vector<8x32xf32> to vector<1x8x32xf32>
    tpu.vector_store %arg15[%71, %c0_31, %c0_32], %74 {strides = array<i32>} : memref<8x8x32xf32, #tpu.memory_space<vmem>>, vector<1x8x32xf32>,
    %75 = tpu.concatenate %49, %66 in 1 : vector<8x32xf32>, vector<8x32xf32> -> vector<8x64xf32>
    %c1_i32 = arith.constant 1 : i32
    %c7_i32_33 = arith.constant 7 : i32
    %76 = arith.subi %c7_i32_33, %c1_i32 : i32
    %77 = arith.index_cast %c1_i32 : i32 to index
    %c0_34 = arith.constant 0 : index
    %c0_35 = arith.constant 0 : index
    %78 = vector.load %arg12[%77, %c0_34, %c0_35] : memref<8x8x128xf32, #tpu.memory_space<vmem>>, vector<1x8x128xf32>
    %79 = vector.shape_cast %78 : vector<1x8x128xf32> to vector<8x128xf32>
    %80 = arith.index_cast %76 : i32 to index
    %c0_36 = arith.constant 0 : index
    %c0_37 = arith.constant 0 : index
    %81 = vector.load %arg13[%80, %c0_36, %c0_37] : memref<8x8x128xf32, #tpu.memory_space<vmem>>, vector<1x8x128xf32>
    %82 = vector.shape_cast %81 : vector<1x8x128xf32> to vector<8x128xf32>
    %83 = tpu.concatenate %79, %82 in 1 : vector<8x128xf32>, vector<8x128xf32> -> vector<8x256xf32>
    %cst_38 = arith.constant dense<0.000000e+00> : vector<8x256xf32>
    %84 = tpu.matmul %75, %20, %cst_38 {dimension_numbers = #tpu.dot_dimension_numbers<[1], [0], [0], [1], [0, 0, 1, 1], [], []>} : vector<8x64xf32>, vector<64x256xf32>, vector<8x256xf32> -> vector<8x256xf32>
    %85 = arith.addf %83, %84 : vector<8x256xf32>
    %86 = vector.extract_strided_slice %85 {offsets = [0, 0], sizes = [8, 128], strides = [1, 1]} : vector<8x256xf32> to vector<8x128xf32>
    %87 = vector.extract_strided_slice %86 {offsets = [0, 0], sizes = [8, 96], strides = [1, 1]} : vector<8x128xf32> to vector<8x96xf32>
    %88 = arith.negf %87 : vector<8x96xf32>
    %89 = math.exp %88 : vector<8x96xf32>
    %cst_39 = arith.constant 1.000000e+00 : f32
    %90 = vector.broadcast %cst_39 : f32 to vector<8x96xf32>
    %91 = arith.addf %90, %89 : vector<8x96xf32>
    %92 = arith.divf %90, %91 : vector<8x96xf32>
    %93 = vector.extract_strided_slice %86 {offsets = [0, 96], sizes = [8, 32], strides = [1, 1]} : vector<8x128xf32> to vector<8x32xf32>
    %94 = math.tanh %93 : vector<8x32xf32>
    %95 = vector.extract_strided_slice %92 {offsets = [0, 0], sizes = [8, 32], strides = [1, 1]} : vector<8x96xf32> to vector<8x32xf32>
    %96 = vector.extract_strided_slice %92 {offsets = [0, 32], sizes = [8, 32], strides = [1, 1]} : vector<8x96xf32> to vector<8x32xf32>
    %97 = vector.extract_strided_slice %92 {offsets = [0, 64], sizes = [8, 32], strides = [1, 1]} : vector<8x96xf32> to vector<8x32xf32>
    %98 = arith.mulf %96, %47 : vector<8x32xf32>
    %99 = arith.mulf %95, %94 : vector<8x32xf32>
    %100 = arith.addf %98, %99 : vector<8x32xf32>
    %101 = math.tanh %100 : vector<8x32xf32>
    %102 = arith.mulf %97, %101 : vector<8x32xf32>
    %103 = vector.extract_strided_slice %85 {offsets = [0, 128], sizes = [8, 128], strides = [1, 1]} : vector<8x256xf32> to vector<8x128xf32>
    %104 = vector.extract_strided_slice %103 {offsets = [0, 0], sizes = [8, 96], strides = [1, 1]} : vector<8x128xf32> to vector<8x96xf32>
    %105 = arith.negf %104 : vector<8x96xf32>
    %106 = math.exp %105 : vector<8x96xf32>
    %cst_40 = arith.constant 1.000000e+00 : f32
    %107 = vector.broadcast %cst_40 : f32 to vector<8x96xf32>
    %108 = arith.addf %107, %106 : vector<8x96xf32>
    %109 = arith.divf %107, %108 : vector<8x96xf32>
    %110 = vector.extract_strided_slice %103 {offsets = [0, 96], sizes = [8, 32], strides = [1, 1]} : vector<8x128xf32> to vector<8x32xf32>
    %111 = math.tanh %110 : vector<8x32xf32>
    %112 = vector.extract_strided_slice %109 {offsets = [0, 0], sizes = [8, 32], strides = [1, 1]} : vector<8x96xf32> to vector<8x32xf32>
    %113 = vector.extract_strided_slice %109 {offsets = [0, 32], sizes = [8, 32], strides = [1, 1]} : vector<8x96xf32> to vector<8x32xf32>
    %114 = vector.extract_strided_slice %109 {offsets = [0, 64], sizes = [8, 32], strides = [1, 1]} : vector<8x96xf32> to vector<8x32xf32>
    %115 = arith.mulf %113, %64 : vector<8x32xf32>
    %116 = arith.mulf %112, %111 : vector<8x32xf32>
    %117 = arith.addf %115, %116 : vector<8x32xf32>
    %118 = math.tanh %117 : vector<8x32xf32>
    %119 = arith.mulf %114, %118 : vector<8x32xf32>
    %120 = arith.index_cast %c1_i32 : i32 to index
    %c0_41 = arith.constant 0 : index
    %c0_42 = arith.constant 0 : index
    %121 = vector.load %arg14[%120, %c0_41, %c0_42] : memref<8x8x32xf32, #tpu.memory_space<vmem>>, vector<1x8x32xf32>
    %122 = vector.shape_cast %121 : vector<1x8x32xf32> to vector<8x32xf32>
    %123 = vector.shape_cast %102 : vector<8x32xf32> to vector<1x8x32xf32>
    tpu.vector_store %arg14[%120, %c0_41, %c0_42], %123 {strides = array<i32>} : memref<8x8x32xf32, #tpu.memory_space<vmem>>, vector<1x8x32xf32>,
    %124 = arith.index_cast %76 : i32 to index
    %c0_43 = arith.constant 0 : index
    %c0_44 = arith.constant 0 : index
    %125 = vector.load %arg15[%124, %c0_43, %c0_44] : memref<8x8x32xf32, #tpu.memory_space<vmem>>, vector<1x8x32xf32>
    %126 = vector.shape_cast %125 : vector<1x8x32xf32> to vector<8x32xf32>
    %127 = vector.shape_cast %119 : vector<8x32xf32> to vector<1x8x32xf32>
    tpu.vector_store %arg15[%124, %c0_43, %c0_44], %127 {strides = array<i32>} : memref<8x8x32xf32, #tpu.memory_space<vmem>>, vector<1x8x32xf32>,
    %128 = tpu.concatenate %102, %119 in 1 : vector<8x32xf32>, vector<8x32xf32> -> vector<8x64xf32>
    %c2_i32 = arith.constant 2 : i32
    %c7_i32_45 = arith.constant 7 : i32
    %129 = arith.subi %c7_i32_45, %c2_i32 : i32
    %130 = arith.index_cast %c2_i32 : i32 to index
    %c0_46 = arith.constant 0 : index
    %c0_47 = arith.constant 0 : index
    %131 = vector.load %arg12[%130, %c0_46, %c0_47] : memref<8x8x128xf32, #tpu.memory_space<vmem>>, vector<1x8x128xf32>
    %132 = vector.shape_cast %131 : vector<1x8x128xf32> to vector<8x128xf32>
    %133 = arith.index_cast %129 : i32 to index
    %c0_48 = arith.constant 0 : index
    %c0_49 = arith.constant 0 : index
    %134 = vector.load %arg13[%133, %c0_48, %c0_49] : memref<8x8x128xf32, #tpu.memory_space<vmem>>, vector<1x8x128xf32>
    %135 = vector.shape_cast %134 : vector<1x8x128xf32> to vector<8x128xf32>
    %136 = tpu.concatenate %132, %135 in 1 : vector<8x128xf32>, vector<8x128xf32> -> vector<8x256xf32>
    %cst_50 = arith.constant dense<0.000000e+00> : vector<8x256xf32>
    %137 = tpu.matmul %128, %20, %cst_50 {dimension_numbers = #tpu.dot_dimension_numbers<[1], [0], [0], [1], [0, 0, 1, 1], [], []>} : vector<8x64xf32>, vector<64x256xf32>, vector<8x256xf32> -> vector<8x256xf32>
    %138 = arith.addf %136, %137 : vector<8x256xf32>
    %139 = vector.extract_strided_slice %138 {offsets = [0, 0], sizes = [8, 128], strides = [1, 1]} : vector<8x256xf32> to vector<8x128xf32>
    %140 = vector.extract_strided_slice %139 {offsets = [0, 0], sizes = [8, 96], strides = [1, 1]} : vector<8x128xf32> to vector<8x96xf32>
    %141 = arith.negf %140 : vector<8x96xf32>
    %142 = math.exp %141 : vector<8x96xf32>
    %cst_51 = arith.constant 1.000000e+00 : f32
    %143 = vector.broadcast %cst_51 : f32 to vector<8x96xf32>
    %144 = arith.addf %143, %142 : vector<8x96xf32>
    %145 = arith.divf %143, %144 : vector<8x96xf32>
    %146 = vector.extract_strided_slice %139 {offsets = [0, 96], sizes = [8, 32], strides = [1, 1]} : vector<8x128xf32> to vector<8x32xf32>
    %147 = math.tanh %146 : vector<8x32xf32>
    %148 = vector.extract_strided_slice %145 {offsets = [0, 0], sizes = [8, 32], strides = [1, 1]} : vector<8x96xf32> to vector<8x32xf32>
    %149 = vector.extract_strided_slice %145 {offsets = [0, 32], sizes = [8, 32], strides = [1, 1]} : vector<8x96xf32> to vector<8x32xf32>
    %150 = vector.extract_strided_slice %145 {offsets = [0, 64], sizes = [8, 32], strides = [1, 1]} : vector<8x96xf32> to vector<8x32xf32>
    %151 = arith.mulf %149, %100 : vector<8x32xf32>
    %152 = arith.mulf %148, %147 : vector<8x32xf32>
    %153 = arith.addf %151, %152 : vector<8x32xf32>
    %154 = math.tanh %153 : vector<8x32xf32>
    %155 = arith.mulf %150, %154 : vector<8x32xf32>
    %156 = vector.extract_strided_slice %138 {offsets = [0, 128], sizes = [8, 128], strides = [1, 1]} : vector<8x256xf32> to vector<8x128xf32>
    %157 = vector.extract_strided_slice %156 {offsets = [0, 0], sizes = [8, 96], strides = [1, 1]} : vector<8x128xf32> to vector<8x96xf32>
    %158 = arith.negf %157 : vector<8x96xf32>
    %159 = math.exp %158 : vector<8x96xf32>
    %cst_52 = arith.constant 1.000000e+00 : f32
    %160 = vector.broadcast %cst_52 : f32 to vector<8x96xf32>
    %161 = arith.addf %160, %159 : vector<8x96xf32>
    %162 = arith.divf %160, %161 : vector<8x96xf32>
    %163 = vector.extract_strided_slice %156 {offsets = [0, 96], sizes = [8, 32], strides = [1, 1]} : vector<8x128xf32> to vector<8x32xf32>
    %164 = math.tanh %163 : vector<8x32xf32>
    %165 = vector.extract_strided_slice %162 {offsets = [0, 0], sizes = [8, 32], strides = [1, 1]} : vector<8x96xf32> to vector<8x32xf32>
    %166 = vector.extract_strided_slice %162 {offsets = [0, 32], sizes = [8, 32], strides = [1, 1]} : vector<8x96xf32> to vector<8x32xf32>
    %167 = vector.extract_strided_slice %162 {offsets = [0, 64], sizes = [8, 32], strides = [1, 1]} : vector<8x96xf32> to vector<8x32xf32>
    %168 = arith.mulf %166, %117 : vector<8x32xf32>
    %169 = arith.mulf %165, %164 : vector<8x32xf32>
    %170 = arith.addf %168, %169 : vector<8x32xf32>
    %171 = math.tanh %170 : vector<8x32xf32>
    %172 = arith.mulf %167, %171 : vector<8x32xf32>
    %173 = arith.index_cast %c2_i32 : i32 to index
    %c0_53 = arith.constant 0 : index
    %c0_54 = arith.constant 0 : index
    %174 = vector.load %arg14[%173, %c0_53, %c0_54] : memref<8x8x32xf32, #tpu.memory_space<vmem>>, vector<1x8x32xf32>
    %175 = vector.shape_cast %174 : vector<1x8x32xf32> to vector<8x32xf32>
    %176 = vector.shape_cast %155 : vector<8x32xf32> to vector<1x8x32xf32>
    tpu.vector_store %arg14[%173, %c0_53, %c0_54], %176 {strides = array<i32>} : memref<8x8x32xf32, #tpu.memory_space<vmem>>, vector<1x8x32xf32>,
    %177 = arith.index_cast %129 : i32 to index
    %c0_55 = arith.constant 0 : index
    %c0_56 = arith.constant 0 : index
    %178 = vector.load %arg15[%177, %c0_55, %c0_56] : memref<8x8x32xf32, #tpu.memory_space<vmem>>, vector<1x8x32xf32>
    %179 = vector.shape_cast %178 : vector<1x8x32xf32> to vector<8x32xf32>
    %180 = vector.shape_cast %172 : vector<8x32xf32> to vector<1x8x32xf32>
    tpu.vector_store %arg15[%177, %c0_55, %c0_56], %180 {strides = array<i32>} : memref<8x8x32xf32, #tpu.memory_space<vmem>>, vector<1x8x32xf32>,
    %181 = tpu.concatenate %155, %172 in 1 : vector<8x32xf32>, vector<8x32xf32> -> vector<8x64xf32>
    %c3_i32 = arith.constant 3 : i32
    %c7_i32_57 = arith.constant 7 : i32
    %182 = arith.subi %c7_i32_57, %c3_i32 : i32
    %183 = arith.index_cast %c3_i32 : i32 to index
    %c0_58 = arith.constant 0 : index
    %c0_59 = arith.constant 0 : index
    %184 = vector.load %arg12[%183, %c0_58, %c0_59] : memref<8x8x128xf32, #tpu.memory_space<vmem>>, vector<1x8x128xf32>
    %185 = vector.shape_cast %184 : vector<1x8x128xf32> to vector<8x128xf32>
    %186 = arith.index_cast %182 : i32 to index
    %c0_60 = arith.constant 0 : index
    %c0_61 = arith.constant 0 : index
    %187 = vector.load %arg13[%186, %c0_60, %c0_61] : memref<8x8x128xf32, #tpu.memory_space<vmem>>, vector<1x8x128xf32>
    %188 = vector.shape_cast %187 : vector<1x8x128xf32> to vector<8x128xf32>
    %189 = tpu.concatenate %185, %188 in 1 : vector<8x128xf32>, vector<8x128xf32> -> vector<8x256xf32>
    %cst_62 = arith.constant dense<0.000000e+00> : vector<8x256xf32>
    %190 = tpu.matmul %181, %20, %cst_62 {dimension_numbers = #tpu.dot_dimension_numbers<[1], [0], [0], [1], [0, 0, 1, 1], [], []>} : vector<8x64xf32>, vector<64x256xf32>, vector<8x256xf32> -> vector<8x256xf32>
    %191 = arith.addf %189, %190 : vector<8x256xf32>
    %192 = vector.extract_strided_slice %191 {offsets = [0, 0], sizes = [8, 128], strides = [1, 1]} : vector<8x256xf32> to vector<8x128xf32>
    %193 = vector.extract_strided_slice %192 {offsets = [0, 0], sizes = [8, 96], strides = [1, 1]} : vector<8x128xf32> to vector<8x96xf32>
    %194 = arith.negf %193 : vector<8x96xf32>
    %195 = math.exp %194 : vector<8x96xf32>
    %cst_63 = arith.constant 1.000000e+00 : f32
    %196 = vector.broadcast %cst_63 : f32 to vector<8x96xf32>
    %197 = arith.addf %196, %195 : vector<8x96xf32>
    %198 = arith.divf %196, %197 : vector<8x96xf32>
    %199 = vector.extract_strided_slice %192 {offsets = [0, 96], sizes = [8, 32], strides = [1, 1]} : vector<8x128xf32> to vector<8x32xf32>
    %200 = math.tanh %199 : vector<8x32xf32>
    %201 = vector.extract_strided_slice %198 {offsets = [0, 0], sizes = [8, 32], strides = [1, 1]} : vector<8x96xf32> to vector<8x32xf32>
    %202 = vector.extract_strided_slice %198 {offsets = [0, 32], sizes = [8, 32], strides = [1, 1]} : vector<8x96xf32> to vector<8x32xf32>
    %203 = vector.extract_strided_slice %198 {offsets = [0, 64], sizes = [8, 32], strides = [1, 1]} : vector<8x96xf32> to vector<8x32xf32>
    %204 = arith.mulf %202, %153 : vector<8x32xf32>
    %205 = arith.mulf %201, %200 : vector<8x32xf32>
    %206 = arith.addf %204, %205 : vector<8x32xf32>
    %207 = math.tanh %206 : vector<8x32xf32>
    %208 = arith.mulf %203, %207 : vector<8x32xf32>
    %209 = vector.extract_strided_slice %191 {offsets = [0, 128], sizes = [8, 128], strides = [1, 1]} : vector<8x256xf32> to vector<8x128xf32>
    %210 = vector.extract_strided_slice %209 {offsets = [0, 0], sizes = [8, 96], strides = [1, 1]} : vector<8x128xf32> to vector<8x96xf32>
    %211 = arith.negf %210 : vector<8x96xf32>
    %212 = math.exp %211 : vector<8x96xf32>
    %cst_64 = arith.constant 1.000000e+00 : f32
    %213 = vector.broadcast %cst_64 : f32 to vector<8x96xf32>
    %214 = arith.addf %213, %212 : vector<8x96xf32>
    %215 = arith.divf %213, %214 : vector<8x96xf32>
    %216 = vector.extract_strided_slice %209 {offsets = [0, 96], sizes = [8, 32], strides = [1, 1]} : vector<8x128xf32> to vector<8x32xf32>
    %217 = math.tanh %216 : vector<8x32xf32>
    %218 = vector.extract_strided_slice %215 {offsets = [0, 0], sizes = [8, 32], strides = [1, 1]} : vector<8x96xf32> to vector<8x32xf32>
    %219 = vector.extract_strided_slice %215 {offsets = [0, 32], sizes = [8, 32], strides = [1, 1]} : vector<8x96xf32> to vector<8x32xf32>
    %220 = vector.extract_strided_slice %215 {offsets = [0, 64], sizes = [8, 32], strides = [1, 1]} : vector<8x96xf32> to vector<8x32xf32>
    %221 = arith.mulf %219, %170 : vector<8x32xf32>
    %222 = arith.mulf %218, %217 : vector<8x32xf32>
    %223 = arith.addf %221, %222 : vector<8x32xf32>
    %224 = math.tanh %223 : vector<8x32xf32>
    %225 = arith.mulf %220, %224 : vector<8x32xf32>
    %226 = arith.index_cast %c3_i32 : i32 to index
    %c0_65 = arith.constant 0 : index
    %c0_66 = arith.constant 0 : index
    %227 = vector.load %arg14[%226, %c0_65, %c0_66] : memref<8x8x32xf32, #tpu.memory_space<vmem>>, vector<1x8x32xf32>
    %228 = vector.shape_cast %227 : vector<1x8x32xf32> to vector<8x32xf32>
    %229 = vector.shape_cast %208 : vector<8x32xf32> to vector<1x8x32xf32>
    tpu.vector_store %arg14[%226, %c0_65, %c0_66], %229 {strides = array<i32>} : memref<8x8x32xf32, #tpu.memory_space<vmem>>, vector<1x8x32xf32>,
    %230 = arith.index_cast %182 : i32 to index
    %c0_67 = arith.constant 0 : index
    %c0_68 = arith.constant 0 : index
    %231 = vector.load %arg15[%230, %c0_67, %c0_68] : memref<8x8x32xf32, #tpu.memory_space<vmem>>, vector<1x8x32xf32>
    %232 = vector.shape_cast %231 : vector<1x8x32xf32> to vector<8x32xf32>
    %233 = vector.shape_cast %225 : vector<8x32xf32> to vector<1x8x32xf32>
    tpu.vector_store %arg15[%230, %c0_67, %c0_68], %233 {strides = array<i32>} : memref<8x8x32xf32, #tpu.memory_space<vmem>>, vector<1x8x32xf32>,
    %234 = tpu.concatenate %208, %225 in 1 : vector<8x32xf32>, vector<8x32xf32> -> vector<8x64xf32>
    %c4_i32 = arith.constant 4 : i32
    %c7_i32_69 = arith.constant 7 : i32
    %235 = arith.subi %c7_i32_69, %c4_i32 : i32
    %236 = arith.index_cast %c4_i32 : i32 to index
    %c0_70 = arith.constant 0 : index
    %c0_71 = arith.constant 0 : index
    %237 = vector.load %arg12[%236, %c0_70, %c0_71] : memref<8x8x128xf32, #tpu.memory_space<vmem>>, vector<1x8x128xf32>
    %238 = vector.shape_cast %237 : vector<1x8x128xf32> to vector<8x128xf32>
    %239 = arith.index_cast %235 : i32 to index
    %c0_72 = arith.constant 0 : index
    %c0_73 = arith.constant 0 : index
    %240 = vector.load %arg13[%239, %c0_72, %c0_73] : memref<8x8x128xf32, #tpu.memory_space<vmem>>, vector<1x8x128xf32>
    %241 = vector.shape_cast %240 : vector<1x8x128xf32> to vector<8x128xf32>
    %242 = tpu.concatenate %238, %241 in 1 : vector<8x128xf32>, vector<8x128xf32> -> vector<8x256xf32>
    %cst_74 = arith.constant dense<0.000000e+00> : vector<8x256xf32>
    %243 = tpu.matmul %234, %20, %cst_74 {dimension_numbers = #tpu.dot_dimension_numbers<[1], [0], [0], [1], [0, 0, 1, 1], [], []>} : vector<8x64xf32>, vector<64x256xf32>, vector<8x256xf32> -> vector<8x256xf32>
    %244 = arith.addf %242, %243 : vector<8x256xf32>
    %245 = vector.extract_strided_slice %244 {offsets = [0, 0], sizes = [8, 128], strides = [1, 1]} : vector<8x256xf32> to vector<8x128xf32>
    %246 = vector.extract_strided_slice %245 {offsets = [0, 0], sizes = [8, 96], strides = [1, 1]} : vector<8x128xf32> to vector<8x96xf32>
    %247 = arith.negf %246 : vector<8x96xf32>
    %248 = math.exp %247 : vector<8x96xf32>
    %cst_75 = arith.constant 1.000000e+00 : f32
    %249 = vector.broadcast %cst_75 : f32 to vector<8x96xf32>
    %250 = arith.addf %249, %248 : vector<8x96xf32>
    %251 = arith.divf %249, %250 : vector<8x96xf32>
    %252 = vector.extract_strided_slice %245 {offsets = [0, 96], sizes = [8, 32], strides = [1, 1]} : vector<8x128xf32> to vector<8x32xf32>
    %253 = math.tanh %252 : vector<8x32xf32>
    %254 = vector.extract_strided_slice %251 {offsets = [0, 0], sizes = [8, 32], strides = [1, 1]} : vector<8x96xf32> to vector<8x32xf32>
    %255 = vector.extract_strided_slice %251 {offsets = [0, 32], sizes = [8, 32], strides = [1, 1]} : vector<8x96xf32> to vector<8x32xf32>
    %256 = vector.extract_strided_slice %251 {offsets = [0, 64], sizes = [8, 32], strides = [1, 1]} : vector<8x96xf32> to vector<8x32xf32>
    %257 = arith.mulf %255, %206 : vector<8x32xf32>
    %258 = arith.mulf %254, %253 : vector<8x32xf32>
    %259 = arith.addf %257, %258 : vector<8x32xf32>
    %260 = math.tanh %259 : vector<8x32xf32>
    %261 = arith.mulf %256, %260 : vector<8x32xf32>
    %262 = vector.extract_strided_slice %244 {offsets = [0, 128], sizes = [8, 128], strides = [1, 1]} : vector<8x256xf32> to vector<8x128xf32>
    %263 = vector.extract_strided_slice %262 {offsets = [0, 0], sizes = [8, 96], strides = [1, 1]} : vector<8x128xf32> to vector<8x96xf32>
    %264 = arith.negf %263 : vector<8x96xf32>
    %265 = math.exp %264 : vector<8x96xf32>
    %cst_76 = arith.constant 1.000000e+00 : f32
    %266 = vector.broadcast %cst_76 : f32 to vector<8x96xf32>
    %267 = arith.addf %266, %265 : vector<8x96xf32>
    %268 = arith.divf %266, %267 : vector<8x96xf32>
    %269 = vector.extract_strided_slice %262 {offsets = [0, 96], sizes = [8, 32], strides = [1, 1]} : vector<8x128xf32> to vector<8x32xf32>
    %270 = math.tanh %269 : vector<8x32xf32>
    %271 = vector.extract_strided_slice %268 {offsets = [0, 0], sizes = [8, 32], strides = [1, 1]} : vector<8x96xf32> to vector<8x32xf32>
    %272 = vector.extract_strided_slice %268 {offsets = [0, 32], sizes = [8, 32], strides = [1, 1]} : vector<8x96xf32> to vector<8x32xf32>
    %273 = vector.extract_strided_slice %268 {offsets = [0, 64], sizes = [8, 32], strides = [1, 1]} : vector<8x96xf32> to vector<8x32xf32>
    %274 = arith.mulf %272, %223 : vector<8x32xf32>
    %275 = arith.mulf %271, %270 : vector<8x32xf32>
    %276 = arith.addf %274, %275 : vector<8x32xf32>
    %277 = math.tanh %276 : vector<8x32xf32>
    %278 = arith.mulf %273, %277 : vector<8x32xf32>
    %279 = arith.index_cast %c4_i32 : i32 to index
    %c0_77 = arith.constant 0 : index
    %c0_78 = arith.constant 0 : index
    %280 = vector.load %arg14[%279, %c0_77, %c0_78] : memref<8x8x32xf32, #tpu.memory_space<vmem>>, vector<1x8x32xf32>
    %281 = vector.shape_cast %280 : vector<1x8x32xf32> to vector<8x32xf32>
    %282 = vector.shape_cast %261 : vector<8x32xf32> to vector<1x8x32xf32>
    tpu.vector_store %arg14[%279, %c0_77, %c0_78], %282 {strides = array<i32>} : memref<8x8x32xf32, #tpu.memory_space<vmem>>, vector<1x8x32xf32>,
    %283 = arith.index_cast %235 : i32 to index
    %c0_79 = arith.constant 0 : index
    %c0_80 = arith.constant 0 : index
    %284 = vector.load %arg15[%283, %c0_79, %c0_80] : memref<8x8x32xf32, #tpu.memory_space<vmem>>, vector<1x8x32xf32>
    %285 = vector.shape_cast %284 : vector<1x8x32xf32> to vector<8x32xf32>
    %286 = vector.shape_cast %278 : vector<8x32xf32> to vector<1x8x32xf32>
    tpu.vector_store %arg15[%283, %c0_79, %c0_80], %286 {strides = array<i32>} : memref<8x8x32xf32, #tpu.memory_space<vmem>>, vector<1x8x32xf32>,
    %287 = tpu.concatenate %261, %278 in 1 : vector<8x32xf32>, vector<8x32xf32> -> vector<8x64xf32>
    %c5_i32 = arith.constant 5 : i32
    %c7_i32_81 = arith.constant 7 : i32
    %288 = arith.subi %c7_i32_81, %c5_i32 : i32
    %289 = arith.index_cast %c5_i32 : i32 to index
    %c0_82 = arith.constant 0 : index
    %c0_83 = arith.constant 0 : index
    %290 = vector.load %arg12[%289, %c0_82, %c0_83] : memref<8x8x128xf32, #tpu.memory_space<vmem>>, vector<1x8x128xf32>
    %291 = vector.shape_cast %290 : vector<1x8x128xf32> to vector<8x128xf32>
    %292 = arith.index_cast %288 : i32 to index
    %c0_84 = arith.constant 0 : index
    %c0_85 = arith.constant 0 : index
    %293 = vector.load %arg13[%292, %c0_84, %c0_85] : memref<8x8x128xf32, #tpu.memory_space<vmem>>, vector<1x8x128xf32>
    %294 = vector.shape_cast %293 : vector<1x8x128xf32> to vector<8x128xf32>
    %295 = tpu.concatenate %291, %294 in 1 : vector<8x128xf32>, vector<8x128xf32> -> vector<8x256xf32>
    %cst_86 = arith.constant dense<0.000000e+00> : vector<8x256xf32>
    %296 = tpu.matmul %287, %20, %cst_86 {dimension_numbers = #tpu.dot_dimension_numbers<[1], [0], [0], [1], [0, 0, 1, 1], [], []>} : vector<8x64xf32>, vector<64x256xf32>, vector<8x256xf32> -> vector<8x256xf32>
    %297 = arith.addf %295, %296 : vector<8x256xf32>
    %298 = vector.extract_strided_slice %297 {offsets = [0, 0], sizes = [8, 128], strides = [1, 1]} : vector<8x256xf32> to vector<8x128xf32>
    %299 = vector.extract_strided_slice %298 {offsets = [0, 0], sizes = [8, 96], strides = [1, 1]} : vector<8x128xf32> to vector<8x96xf32>
    %300 = arith.negf %299 : vector<8x96xf32>
    %301 = math.exp %300 : vector<8x96xf32>
    %cst_87 = arith.constant 1.000000e+00 : f32
    %302 = vector.broadcast %cst_87 : f32 to vector<8x96xf32>
    %303 = arith.addf %302, %301 : vector<8x96xf32>
    %304 = arith.divf %302, %303 : vector<8x96xf32>
    %305 = vector.extract_strided_slice %298 {offsets = [0, 96], sizes = [8, 32], strides = [1, 1]} : vector<8x128xf32> to vector<8x32xf32>
    %306 = math.tanh %305 : vector<8x32xf32>
    %307 = vector.extract_strided_slice %304 {offsets = [0, 0], sizes = [8, 32], strides = [1, 1]} : vector<8x96xf32> to vector<8x32xf32>
    %308 = vector.extract_strided_slice %304 {offsets = [0, 32], sizes = [8, 32], strides = [1, 1]} : vector<8x96xf32> to vector<8x32xf32>
    %309 = vector.extract_strided_slice %304 {offsets = [0, 64], sizes = [8, 32], strides = [1, 1]} : vector<8x96xf32> to vector<8x32xf32>
    %310 = arith.mulf %308, %259 : vector<8x32xf32>
    %311 = arith.mulf %307, %306 : vector<8x32xf32>
    %312 = arith.addf %310, %311 : vector<8x32xf32>
    %313 = math.tanh %312 : vector<8x32xf32>
    %314 = arith.mulf %309, %313 : vector<8x32xf32>
    %315 = vector.extract_strided_slice %297 {offsets = [0, 128], sizes = [8, 128], strides = [1, 1]} : vector<8x256xf32> to vector<8x128xf32>
    %316 = vector.extract_strided_slice %315 {offsets = [0, 0], sizes = [8, 96], strides = [1, 1]} : vector<8x128xf32> to vector<8x96xf32>
    %317 = arith.negf %316 : vector<8x96xf32>
    %318 = math.exp %317 : vector<8x96xf32>
    %cst_88 = arith.constant 1.000000e+00 : f32
    %319 = vector.broadcast %cst_88 : f32 to vector<8x96xf32>
    %320 = arith.addf %319, %318 : vector<8x96xf32>
    %321 = arith.divf %319, %320 : vector<8x96xf32>
    %322 = vector.extract_strided_slice %315 {offsets = [0, 96], sizes = [8, 32], strides = [1, 1]} : vector<8x128xf32> to vector<8x32xf32>
    %323 = math.tanh %322 : vector<8x32xf32>
    %324 = vector.extract_strided_slice %321 {offsets = [0, 0], sizes = [8, 32], strides = [1, 1]} : vector<8x96xf32> to vector<8x32xf32>
    %325 = vector.extract_strided_slice %321 {offsets = [0, 32], sizes = [8, 32], strides = [1, 1]} : vector<8x96xf32> to vector<8x32xf32>
    %326 = vector.extract_strided_slice %321 {offsets = [0, 64], sizes = [8, 32], strides = [1, 1]} : vector<8x96xf32> to vector<8x32xf32>
    %327 = arith.mulf %325, %276 : vector<8x32xf32>
    %328 = arith.mulf %324, %323 : vector<8x32xf32>
    %329 = arith.addf %327, %328 : vector<8x32xf32>
    %330 = math.tanh %329 : vector<8x32xf32>
    %331 = arith.mulf %326, %330 : vector<8x32xf32>
    %332 = arith.index_cast %c5_i32 : i32 to index
    %c0_89 = arith.constant 0 : index
    %c0_90 = arith.constant 0 : index
    %333 = vector.load %arg14[%332, %c0_89, %c0_90] : memref<8x8x32xf32, #tpu.memory_space<vmem>>, vector<1x8x32xf32>
    %334 = vector.shape_cast %333 : vector<1x8x32xf32> to vector<8x32xf32>
    %335 = vector.shape_cast %314 : vector<8x32xf32> to vector<1x8x32xf32>
    tpu.vector_store %arg14[%332, %c0_89, %c0_90], %335 {strides = array<i32>} : memref<8x8x32xf32, #tpu.memory_space<vmem>>, vector<1x8x32xf32>,
    %336 = arith.index_cast %288 : i32 to index
    %c0_91 = arith.constant 0 : index
    %c0_92 = arith.constant 0 : index
    %337 = vector.load %arg15[%336, %c0_91, %c0_92] : memref<8x8x32xf32, #tpu.memory_space<vmem>>, vector<1x8x32xf32>
    %338 = vector.shape_cast %337 : vector<1x8x32xf32> to vector<8x32xf32>
    %339 = vector.shape_cast %331 : vector<8x32xf32> to vector<1x8x32xf32>
    tpu.vector_store %arg15[%336, %c0_91, %c0_92], %339 {strides = array<i32>} : memref<8x8x32xf32, #tpu.memory_space<vmem>>, vector<1x8x32xf32>,
    %340 = tpu.concatenate %314, %331 in 1 : vector<8x32xf32>, vector<8x32xf32> -> vector<8x64xf32>
    %c6_i32 = arith.constant 6 : i32
    %c7_i32_93 = arith.constant 7 : i32
    %341 = arith.subi %c7_i32_93, %c6_i32 : i32
    %342 = arith.index_cast %c6_i32 : i32 to index
    %c0_94 = arith.constant 0 : index
    %c0_95 = arith.constant 0 : index
    %343 = vector.load %arg12[%342, %c0_94, %c0_95] : memref<8x8x128xf32, #tpu.memory_space<vmem>>, vector<1x8x128xf32>
    %344 = vector.shape_cast %343 : vector<1x8x128xf32> to vector<8x128xf32>
    %345 = arith.index_cast %341 : i32 to index
    %c0_96 = arith.constant 0 : index
    %c0_97 = arith.constant 0 : index
    %346 = vector.load %arg13[%345, %c0_96, %c0_97] : memref<8x8x128xf32, #tpu.memory_space<vmem>>, vector<1x8x128xf32>
    %347 = vector.shape_cast %346 : vector<1x8x128xf32> to vector<8x128xf32>
    %348 = tpu.concatenate %344, %347 in 1 : vector<8x128xf32>, vector<8x128xf32> -> vector<8x256xf32>
    %cst_98 = arith.constant dense<0.000000e+00> : vector<8x256xf32>
    %349 = tpu.matmul %340, %20, %cst_98 {dimension_numbers = #tpu.dot_dimension_numbers<[1], [0], [0], [1], [0, 0, 1, 1], [], []>} : vector<8x64xf32>, vector<64x256xf32>, vector<8x256xf32> -> vector<8x256xf32>
    %350 = arith.addf %348, %349 : vector<8x256xf32>
    %351 = vector.extract_strided_slice %350 {offsets = [0, 0], sizes = [8, 128], strides = [1, 1]} : vector<8x256xf32> to vector<8x128xf32>
    %352 = vector.extract_strided_slice %351 {offsets = [0, 0], sizes = [8, 96], strides = [1, 1]} : vector<8x128xf32> to vector<8x96xf32>
    %353 = arith.negf %352 : vector<8x96xf32>
    %354 = math.exp %353 : vector<8x96xf32>
    %cst_99 = arith.constant 1.000000e+00 : f32
    %355 = vector.broadcast %cst_99 : f32 to vector<8x96xf32>
    %356 = arith.addf %355, %354 : vector<8x96xf32>
    %357 = arith.divf %355, %356 : vector<8x96xf32>
    %358 = vector.extract_strided_slice %351 {offsets = [0, 96], sizes = [8, 32], strides = [1, 1]} : vector<8x128xf32> to vector<8x32xf32>
    %359 = math.tanh %358 : vector<8x32xf32>
    %360 = vector.extract_strided_slice %357 {offsets = [0, 0], sizes = [8, 32], strides = [1, 1]} : vector<8x96xf32> to vector<8x32xf32>
    %361 = vector.extract_strided_slice %357 {offsets = [0, 32], sizes = [8, 32], strides = [1, 1]} : vector<8x96xf32> to vector<8x32xf32>
    %362 = vector.extract_strided_slice %357 {offsets = [0, 64], sizes = [8, 32], strides = [1, 1]} : vector<8x96xf32> to vector<8x32xf32>
    %363 = arith.mulf %361, %312 : vector<8x32xf32>
    %364 = arith.mulf %360, %359 : vector<8x32xf32>
    %365 = arith.addf %363, %364 : vector<8x32xf32>
    %366 = math.tanh %365 : vector<8x32xf32>
    %367 = arith.mulf %362, %366 : vector<8x32xf32>
    %368 = vector.extract_strided_slice %350 {offsets = [0, 128], sizes = [8, 128], strides = [1, 1]} : vector<8x256xf32> to vector<8x128xf32>
    %369 = vector.extract_strided_slice %368 {offsets = [0, 0], sizes = [8, 96], strides = [1, 1]} : vector<8x128xf32> to vector<8x96xf32>
    %370 = arith.negf %369 : vector<8x96xf32>
    %371 = math.exp %370 : vector<8x96xf32>
    %cst_100 = arith.constant 1.000000e+00 : f32
    %372 = vector.broadcast %cst_100 : f32 to vector<8x96xf32>
    %373 = arith.addf %372, %371 : vector<8x96xf32>
    %374 = arith.divf %372, %373 : vector<8x96xf32>
    %375 = vector.extract_strided_slice %368 {offsets = [0, 96], sizes = [8, 32], strides = [1, 1]} : vector<8x128xf32> to vector<8x32xf32>
    %376 = math.tanh %375 : vector<8x32xf32>
    %377 = vector.extract_strided_slice %374 {offsets = [0, 0], sizes = [8, 32], strides = [1, 1]} : vector<8x96xf32> to vector<8x32xf32>
    %378 = vector.extract_strided_slice %374 {offsets = [0, 32], sizes = [8, 32], strides = [1, 1]} : vector<8x96xf32> to vector<8x32xf32>
    %379 = vector.extract_strided_slice %374 {offsets = [0, 64], sizes = [8, 32], strides = [1, 1]} : vector<8x96xf32> to vector<8x32xf32>
    %380 = arith.mulf %378, %329 : vector<8x32xf32>
    %381 = arith.mulf %377, %376 : vector<8x32xf32>
    %382 = arith.addf %380, %381 : vector<8x32xf32>
    %383 = math.tanh %382 : vector<8x32xf32>
    %384 = arith.mulf %379, %383 : vector<8x32xf32>
    %385 = arith.index_cast %c6_i32 : i32 to index
    %c0_101 = arith.constant 0 : index
    %c0_102 = arith.constant 0 : index
    %386 = vector.load %arg14[%385, %c0_101, %c0_102] : memref<8x8x32xf32, #tpu.memory_space<vmem>>, vector<1x8x32xf32>
    %387 = vector.shape_cast %386 : vector<1x8x32xf32> to vector<8x32xf32>
    %388 = vector.shape_cast %367 : vector<8x32xf32> to vector<1x8x32xf32>
    tpu.vector_store %arg14[%385, %c0_101, %c0_102], %388 {strides = array<i32>} : memref<8x8x32xf32, #tpu.memory_space<vmem>>, vector<1x8x32xf32>,
    %389 = arith.index_cast %341 : i32 to index
    %c0_103 = arith.constant 0 : index
    %c0_104 = arith.constant 0 : index
    %390 = vector.load %arg15[%389, %c0_103, %c0_104] : memref<8x8x32xf32, #tpu.memory_space<vmem>>, vector<1x8x32xf32>
    %391 = vector.shape_cast %390 : vector<1x8x32xf32> to vector<8x32xf32>
    %392 = vector.shape_cast %384 : vector<8x32xf32> to vector<1x8x32xf32>
    tpu.vector_store %arg15[%389, %c0_103, %c0_104], %392 {strides = array<i32>} : memref<8x8x32xf32, #tpu.memory_space<vmem>>, vector<1x8x32xf32>,
    %393 = tpu.concatenate %367, %384 in 1 : vector<8x32xf32>, vector<8x32xf32> -> vector<8x64xf32>
    %c7_i32_105 = arith.constant 7 : i32
    %c7_i32_106 = arith.constant 7 : i32
    %394 = arith.subi %c7_i32_106, %c7_i32_105 : i32
    %395 = arith.index_cast %c7_i32_105 : i32 to index
    %c0_107 = arith.constant 0 : index
    %c0_108 = arith.constant 0 : index
    %396 = vector.load %arg12[%395, %c0_107, %c0_108] : memref<8x8x128xf32, #tpu.memory_space<vmem>>, vector<1x8x128xf32>
    %397 = vector.shape_cast %396 : vector<1x8x128xf32> to vector<8x128xf32>
    %398 = arith.index_cast %394 : i32 to index
    %c0_109 = arith.constant 0 : index
    %c0_110 = arith.constant 0 : index
    %399 = vector.load %arg13[%398, %c0_109, %c0_110] : memref<8x8x128xf32, #tpu.memory_space<vmem>>, vector<1x8x128xf32>
    %400 = vector.shape_cast %399 : vector<1x8x128xf32> to vector<8x128xf32>
    %401 = tpu.concatenate %397, %400 in 1 : vector<8x128xf32>, vector<8x128xf32> -> vector<8x256xf32>
    %cst_111 = arith.constant dense<0.000000e+00> : vector<8x256xf32>
    %402 = tpu.matmul %393, %20, %cst_111 {dimension_numbers = #tpu.dot_dimension_numbers<[1], [0], [0], [1], [0, 0, 1, 1], [], []>} : vector<8x64xf32>, vector<64x256xf32>, vector<8x256xf32> -> vector<8x256xf32>
    %403 = arith.addf %401, %402 : vector<8x256xf32>
    %404 = vector.extract_strided_slice %403 {offsets = [0, 0], sizes = [8, 128], strides = [1, 1]} : vector<8x256xf32> to vector<8x128xf32>
    %405 = vector.extract_strided_slice %404 {offsets = [0, 0], sizes = [8, 96], strides = [1, 1]} : vector<8x128xf32> to vector<8x96xf32>
    %406 = arith.negf %405 : vector<8x96xf32>
    %407 = math.exp %406 : vector<8x96xf32>
    %cst_112 = arith.constant 1.000000e+00 : f32
    %408 = vector.broadcast %cst_112 : f32 to vector<8x96xf32>
    %409 = arith.addf %408, %407 : vector<8x96xf32>
    %410 = arith.divf %408, %409 : vector<8x96xf32>
    %411 = vector.extract_strided_slice %404 {offsets = [0, 96], sizes = [8, 32], strides = [1, 1]} : vector<8x128xf32> to vector<8x32xf32>
    %412 = math.tanh %411 : vector<8x32xf32>
    %413 = vector.extract_strided_slice %410 {offsets = [0, 0], sizes = [8, 32], strides = [1, 1]} : vector<8x96xf32> to vector<8x32xf32>
    %414 = vector.extract_strided_slice %410 {offsets = [0, 32], sizes = [8, 32], strides = [1, 1]} : vector<8x96xf32> to vector<8x32xf32>
    %415 = vector.extract_strided_slice %410 {offsets = [0, 64], sizes = [8, 32], strides = [1, 1]} : vector<8x96xf32> to vector<8x32xf32>
    %416 = arith.mulf %414, %365 : vector<8x32xf32>
    %417 = arith.mulf %413, %412 : vector<8x32xf32>
    %418 = arith.addf %416, %417 : vector<8x32xf32>
    %419 = math.tanh %418 : vector<8x32xf32>
    %420 = arith.mulf %415, %419 : vector<8x32xf32>
    %421 = vector.extract_strided_slice %403 {offsets = [0, 128], sizes = [8, 128], strides = [1, 1]} : vector<8x256xf32> to vector<8x128xf32>
    %422 = vector.extract_strided_slice %421 {offsets = [0, 0], sizes = [8, 96], strides = [1, 1]} : vector<8x128xf32> to vector<8x96xf32>
    %423 = arith.negf %422 : vector<8x96xf32>
    %424 = math.exp %423 : vector<8x96xf32>
    %cst_113 = arith.constant 1.000000e+00 : f32
    %425 = vector.broadcast %cst_113 : f32 to vector<8x96xf32>
    %426 = arith.addf %425, %424 : vector<8x96xf32>
    %427 = arith.divf %425, %426 : vector<8x96xf32>
    %428 = vector.extract_strided_slice %421 {offsets = [0, 96], sizes = [8, 32], strides = [1, 1]} : vector<8x128xf32> to vector<8x32xf32>
    %429 = math.tanh %428 : vector<8x32xf32>
    %430 = vector.extract_strided_slice %427 {offsets = [0, 0], sizes = [8, 32], strides = [1, 1]} : vector<8x96xf32> to vector<8x32xf32>
    %431 = vector.extract_strided_slice %427 {offsets = [0, 32], sizes = [8, 32], strides = [1, 1]} : vector<8x96xf32> to vector<8x32xf32>
    %432 = vector.extract_strided_slice %427 {offsets = [0, 64], sizes = [8, 32], strides = [1, 1]} : vector<8x96xf32> to vector<8x32xf32>
    %433 = arith.mulf %431, %382 : vector<8x32xf32>
    %434 = arith.mulf %430, %429 : vector<8x32xf32>
    %435 = arith.addf %433, %434 : vector<8x32xf32>
    %436 = math.tanh %435 : vector<8x32xf32>
    %437 = arith.mulf %432, %436 : vector<8x32xf32>
    %438 = arith.index_cast %c7_i32_105 : i32 to index
    %c0_114 = arith.constant 0 : index
    %c0_115 = arith.constant 0 : index
    %439 = vector.load %arg14[%438, %c0_114, %c0_115] : memref<8x8x32xf32, #tpu.memory_space<vmem>>, vector<1x8x32xf32>
    %440 = vector.shape_cast %439 : vector<1x8x32xf32> to vector<8x32xf32>
    %441 = vector.shape_cast %420 : vector<8x32xf32> to vector<1x8x32xf32>
    tpu.vector_store %arg14[%438, %c0_114, %c0_115], %441 {strides = array<i32>} : memref<8x8x32xf32, #tpu.memory_space<vmem>>, vector<1x8x32xf32>,
    %442 = arith.index_cast %394 : i32 to index
    %c0_116 = arith.constant 0 : index
    %c0_117 = arith.constant 0 : index
    %443 = vector.load %arg15[%442, %c0_116, %c0_117] : memref<8x8x32xf32, #tpu.memory_space<vmem>>, vector<1x8x32xf32>
    %444 = vector.shape_cast %443 : vector<1x8x32xf32> to vector<8x32xf32>
    %445 = vector.shape_cast %437 : vector<8x32xf32> to vector<1x8x32xf32>
    tpu.vector_store %arg15[%442, %c0_116, %c0_117], %445 {strides = array<i32>} : memref<8x8x32xf32, #tpu.memory_space<vmem>>, vector<1x8x32xf32>,
    %446 = tpu.concatenate %420, %437 in 1 : vector<8x32xf32>, vector<8x32xf32> -> vector<8x64xf32>
    %c8_i32 = arith.constant 8 : i32
    %c0_118 = arith.constant 0 : index
    %c0_119 = arith.constant 0 : index
    %c0_120 = arith.constant 0 : index
    %447 = vector.load %arg14[%c0_118, %c0_119, %c0_120] : memref<8x8x32xf32, #tpu.memory_space<vmem>>, vector<8x8x32xf32>
    %448 = vector.shape_cast %447 : vector<8x8x32xf32> to vector<64x32xf32>
    %c0_121 = arith.constant 0 : index
    %c0_122 = arith.constant 0 : index
    %449 = vector.load %arg8[%c0_121, %c0_122] : memref<32x128xf32, #tpu.memory_space<vmem>>, vector<32x128xf32>
    %cst_123 = arith.constant dense<0.000000e+00> : vector<64x128xf32>
    %450 = tpu.matmul %448, %449, %cst_123 {dimension_numbers = #tpu.dot_dimension_numbers<[1], [0], [0], [1], [0, 0, 1, 1], [], []>} : vector<64x32xf32>, vector<32x128xf32>, vector<64x128xf32> -> vector<64x128xf32>
    %c0_124 = arith.constant 0 : index
    %c0_125 = arith.constant 0 : index
    %c0_126 = arith.constant 0 : index
    %451 = vector.load %arg15[%c0_124, %c0_125, %c0_126] : memref<8x8x32xf32, #tpu.memory_space<vmem>>, vector<8x8x32xf32>
    %452 = vector.shape_cast %451 : vector<8x8x32xf32> to vector<64x32xf32>
    %c0_127 = arith.constant 0 : index
    %c0_128 = arith.constant 0 : index
    %453 = vector.load %arg9[%c0_127, %c0_128] : memref<32x128xf32, #tpu.memory_space<vmem>>, vector<32x128xf32>
    %cst_129 = arith.constant dense<0.000000e+00> : vector<64x128xf32>
    %454 = tpu.matmul %452, %453, %cst_129 {dimension_numbers = #tpu.dot_dimension_numbers<[1], [0], [0], [1], [0, 0, 1, 1], [], []>} : vector<64x32xf32>, vector<32x128xf32>, vector<64x128xf32> -> vector<64x128xf32>
    %455 = arith.addf %450, %454 : vector<64x128xf32>
    %456 = vector.shape_cast %455 : vector<64x128xf32> to vector<8x8x128xf32>
    %c0_130 = arith.constant 0 : index
    %457 = memref.load %arg10[%c0_130] : memref<1xf32, #tpu.memory_space<smem>>
    %458 = vector.extract_strided_slice %456 {offsets = [0, 0, 0], sizes = [1, 8, 1], strides = [1, 1, 1]} : vector<8x8x128xf32> to vector<1x8x1xf32>
    %459 = vector.shape_cast %458 : vector<1x8x1xf32> to vector<8x1xf32>
    %460 = vector.broadcast %457 : f32 to vector<8x1xf32>
    %461 = arith.addf %459, %460 : vector<8x1xf32>
    %c0_131 = arith.constant 0 : index
    %c0_132 = arith.constant 0 : index
    %c0_133 = arith.constant 0 : index
    %462 = vector.load %arg2[%c0_131, %c0_132, %c0_133] : memref<8x8x1xf32, #tpu.memory_space<vmem>>, vector<1x8x1xf32>
    %463 = vector.shape_cast %462 : vector<1x8x1xf32> to vector<8x1xf32>
    %464 = arith.mulf %461, %463 : vector<8x1xf32>
    %465 = vector.extract_strided_slice %456 {offsets = [1, 0, 0], sizes = [1, 8, 1], strides = [1, 1, 1]} : vector<8x8x128xf32> to vector<1x8x1xf32>
    %466 = vector.shape_cast %465 : vector<1x8x1xf32> to vector<8x1xf32>
    %467 = vector.broadcast %457 : f32 to vector<8x1xf32>
    %468 = arith.addf %466, %467 : vector<8x1xf32>
    %c1 = arith.constant 1 : index
    %c0_134 = arith.constant 0 : index
    %c0_135 = arith.constant 0 : index
    %469 = vector.load %arg2[%c1, %c0_134, %c0_135] : memref<8x8x1xf32, #tpu.memory_space<vmem>>, vector<1x8x1xf32>
    %470 = vector.shape_cast %469 : vector<1x8x1xf32> to vector<8x1xf32>
    %471 = arith.mulf %468, %470 : vector<8x1xf32>
    %472 = vector.extract_strided_slice %456 {offsets = [2, 0, 0], sizes = [1, 8, 1], strides = [1, 1, 1]} : vector<8x8x128xf32> to vector<1x8x1xf32>
    %473 = vector.shape_cast %472 : vector<1x8x1xf32> to vector<8x1xf32>
    %474 = vector.broadcast %457 : f32 to vector<8x1xf32>
    %475 = arith.addf %473, %474 : vector<8x1xf32>
    %c2 = arith.constant 2 : index
    %c0_136 = arith.constant 0 : index
    %c0_137 = arith.constant 0 : index
    %476 = vector.load %arg2[%c2, %c0_136, %c0_137] : memref<8x8x1xf32, #tpu.memory_space<vmem>>, vector<1x8x1xf32>
    %477 = vector.shape_cast %476 : vector<1x8x1xf32> to vector<8x1xf32>
    %478 = arith.mulf %475, %477 : vector<8x1xf32>
    %479 = vector.extract_strided_slice %456 {offsets = [3, 0, 0], sizes = [1, 8, 1], strides = [1, 1, 1]} : vector<8x8x128xf32> to vector<1x8x1xf32>
    %480 = vector.shape_cast %479 : vector<1x8x1xf32> to vector<8x1xf32>
    %481 = vector.broadcast %457 : f32 to vector<8x1xf32>
    %482 = arith.addf %480, %481 : vector<8x1xf32>
    %c3 = arith.constant 3 : index
    %c0_138 = arith.constant 0 : index
    %c0_139 = arith.constant 0 : index
    %483 = vector.load %arg2[%c3, %c0_138, %c0_139] : memref<8x8x1xf32, #tpu.memory_space<vmem>>, vector<1x8x1xf32>
    %484 = vector.shape_cast %483 : vector<1x8x1xf32> to vector<8x1xf32>
    %485 = arith.mulf %482, %484 : vector<8x1xf32>
    %486 = vector.extract_strided_slice %456 {offsets = [4, 0, 0], sizes = [1, 8, 1], strides = [1, 1, 1]} : vector<8x8x128xf32> to vector<1x8x1xf32>
    %487 = vector.shape_cast %486 : vector<1x8x1xf32> to vector<8x1xf32>
    %488 = vector.broadcast %457 : f32 to vector<8x1xf32>
    %489 = arith.addf %487, %488 : vector<8x1xf32>
    %c4 = arith.constant 4 : index
    %c0_140 = arith.constant 0 : index
    %c0_141 = arith.constant 0 : index
    %490 = vector.load %arg2[%c4, %c0_140, %c0_141] : memref<8x8x1xf32, #tpu.memory_space<vmem>>, vector<1x8x1xf32>
    %491 = vector.shape_cast %490 : vector<1x8x1xf32> to vector<8x1xf32>
    %492 = arith.mulf %489, %491 : vector<8x1xf32>
    %493 = vector.extract_strided_slice %456 {offsets = [5, 0, 0], sizes = [1, 8, 1], strides = [1, 1, 1]} : vector<8x8x128xf32> to vector<1x8x1xf32>
    %494 = vector.shape_cast %493 : vector<1x8x1xf32> to vector<8x1xf32>
    %495 = vector.broadcast %457 : f32 to vector<8x1xf32>
    %496 = arith.addf %494, %495 : vector<8x1xf32>
    %c5 = arith.constant 5 : index
    %c0_142 = arith.constant 0 : index
    %c0_143 = arith.constant 0 : index
    %497 = vector.load %arg2[%c5, %c0_142, %c0_143] : memref<8x8x1xf32, #tpu.memory_space<vmem>>, vector<1x8x1xf32>
    %498 = vector.shape_cast %497 : vector<1x8x1xf32> to vector<8x1xf32>
    %499 = arith.mulf %496, %498 : vector<8x1xf32>
    %500 = vector.extract_strided_slice %456 {offsets = [6, 0, 0], sizes = [1, 8, 1], strides = [1, 1, 1]} : vector<8x8x128xf32> to vector<1x8x1xf32>
    %501 = vector.shape_cast %500 : vector<1x8x1xf32> to vector<8x1xf32>
    %502 = vector.broadcast %457 : f32 to vector<8x1xf32>
    %503 = arith.addf %501, %502 : vector<8x1xf32>
    %c6 = arith.constant 6 : index
    %c0_144 = arith.constant 0 : index
    %c0_145 = arith.constant 0 : index
    %504 = vector.load %arg2[%c6, %c0_144, %c0_145] : memref<8x8x1xf32, #tpu.memory_space<vmem>>, vector<1x8x1xf32>
    %505 = vector.shape_cast %504 : vector<1x8x1xf32> to vector<8x1xf32>
    %506 = arith.mulf %503, %505 : vector<8x1xf32>
    %507 = vector.extract_strided_slice %456 {offsets = [7, 0, 0], sizes = [1, 8, 1], strides = [1, 1, 1]} : vector<8x8x128xf32> to vector<1x8x1xf32>
    %508 = vector.shape_cast %507 : vector<1x8x1xf32> to vector<8x1xf32>
    %509 = vector.broadcast %457 : f32 to vector<8x1xf32>
    %510 = arith.addf %508, %509 : vector<8x1xf32>
    %c7 = arith.constant 7 : index
    %c0_146 = arith.constant 0 : index
    %c0_147 = arith.constant 0 : index
    %511 = vector.load %arg2[%c7, %c0_146, %c0_147] : memref<8x8x1xf32, #tpu.memory_space<vmem>>, vector<1x8x1xf32>
    %512 = vector.shape_cast %511 : vector<1x8x1xf32> to vector<8x1xf32>
    %513 = arith.mulf %510, %512 : vector<8x1xf32>
    %514 = arith.maximumf %464, %471 : vector<8x1xf32>
    %515 = arith.maximumf %514, %478 : vector<8x1xf32>
    %516 = arith.maximumf %515, %485 : vector<8x1xf32>
    %517 = arith.maximumf %516, %492 : vector<8x1xf32>
    %518 = arith.maximumf %517, %499 : vector<8x1xf32>
    %519 = arith.maximumf %518, %506 : vector<8x1xf32>
    %520 = arith.maximumf %519, %513 : vector<8x1xf32>
    %521 = arith.subf %464, %520 : vector<8x1xf32>
    %522 = math.exp %521 : vector<8x1xf32>
    %523 = arith.subf %471, %520 : vector<8x1xf32>
    %524 = math.exp %523 : vector<8x1xf32>
    %525 = arith.subf %478, %520 : vector<8x1xf32>
    %526 = math.exp %525 : vector<8x1xf32>
    %527 = arith.subf %485, %520 : vector<8x1xf32>
    %528 = math.exp %527 : vector<8x1xf32>
    %529 = arith.subf %492, %520 : vector<8x1xf32>
    %530 = math.exp %529 : vector<8x1xf32>
    %531 = arith.subf %499, %520 : vector<8x1xf32>
    %532 = math.exp %531 : vector<8x1xf32>
    %533 = arith.subf %506, %520 : vector<8x1xf32>
    %534 = math.exp %533 : vector<8x1xf32>
    %535 = arith.subf %513, %520 : vector<8x1xf32>
    %536 = math.exp %535 : vector<8x1xf32>
    %537 = arith.addf %522, %524 : vector<8x1xf32>
    %538 = arith.addf %537, %526 : vector<8x1xf32>
    %539 = arith.addf %538, %528 : vector<8x1xf32>
    %540 = arith.addf %539, %530 : vector<8x1xf32>
    %541 = arith.addf %540, %532 : vector<8x1xf32>
    %542 = arith.addf %541, %534 : vector<8x1xf32>
    %543 = arith.addf %542, %536 : vector<8x1xf32>
    %544 = vector.extract_strided_slice %456 {offsets = [0, 0, 0], sizes = [1, 8, 128], strides = [1, 1, 1]} : vector<8x8x128xf32> to vector<1x8x128xf32>
    %545 = vector.shape_cast %544 : vector<1x8x128xf32> to vector<8x128xf32>
    %546 = vector.broadcast %522 : vector<8x1xf32> to vector<8x128xf32>
    %547 = arith.mulf %546, %545 : vector<8x128xf32>
    %548 = vector.extract_strided_slice %456 {offsets = [1, 0, 0], sizes = [1, 8, 128], strides = [1, 1, 1]} : vector<8x8x128xf32> to vector<1x8x128xf32>
    %549 = vector.shape_cast %548 : vector<1x8x128xf32> to vector<8x128xf32>
    %550 = vector.broadcast %524 : vector<8x1xf32> to vector<8x128xf32>
    %551 = arith.mulf %550, %549 : vector<8x128xf32>
    %552 = arith.addf %547, %551 : vector<8x128xf32>
    %553 = vector.extract_strided_slice %456 {offsets = [2, 0, 0], sizes = [1, 8, 128], strides = [1, 1, 1]} : vector<8x8x128xf32> to vector<1x8x128xf32>
    %554 = vector.shape_cast %553 : vector<1x8x128xf32> to vector<8x128xf32>
    %555 = vector.broadcast %526 : vector<8x1xf32> to vector<8x128xf32>
    %556 = arith.mulf %555, %554 : vector<8x128xf32>
    %557 = arith.addf %552, %556 : vector<8x128xf32>
    %558 = vector.extract_strided_slice %456 {offsets = [3, 0, 0], sizes = [1, 8, 128], strides = [1, 1, 1]} : vector<8x8x128xf32> to vector<1x8x128xf32>
    %559 = vector.shape_cast %558 : vector<1x8x128xf32> to vector<8x128xf32>
    %560 = vector.broadcast %528 : vector<8x1xf32> to vector<8x128xf32>
    %561 = arith.mulf %560, %559 : vector<8x128xf32>
    %562 = arith.addf %557, %561 : vector<8x128xf32>
    %563 = vector.extract_strided_slice %456 {offsets = [4, 0, 0], sizes = [1, 8, 128], strides = [1, 1, 1]} : vector<8x8x128xf32> to vector<1x8x128xf32>
    %564 = vector.shape_cast %563 : vector<1x8x128xf32> to vector<8x128xf32>
    %565 = vector.broadcast %530 : vector<8x1xf32> to vector<8x128xf32>
    %566 = arith.mulf %565, %564 : vector<8x128xf32>
    %567 = arith.addf %562, %566 : vector<8x128xf32>
    %568 = vector.extract_strided_slice %456 {offsets = [5, 0, 0], sizes = [1, 8, 128], strides = [1, 1, 1]} : vector<8x8x128xf32> to vector<1x8x128xf32>
    %569 = vector.shape_cast %568 : vector<1x8x128xf32> to vector<8x128xf32>
    %570 = vector.broadcast %532 : vector<8x1xf32> to vector<8x128xf32>
    %571 = arith.mulf %570, %569 : vector<8x128xf32>
    %572 = arith.addf %567, %571 : vector<8x128xf32>
    %573 = vector.extract_strided_slice %456 {offsets = [6, 0, 0], sizes = [1, 8, 128], strides = [1, 1, 1]} : vector<8x8x128xf32> to vector<1x8x128xf32>
    %574 = vector.shape_cast %573 : vector<1x8x128xf32> to vector<8x128xf32>
    %575 = vector.broadcast %534 : vector<8x1xf32> to vector<8x128xf32>
    %576 = arith.mulf %575, %574 : vector<8x128xf32>
    %577 = arith.addf %572, %576 : vector<8x128xf32>
    %578 = vector.extract_strided_slice %456 {offsets = [7, 0, 0], sizes = [1, 8, 128], strides = [1, 1, 1]} : vector<8x8x128xf32> to vector<1x8x128xf32>
    %579 = vector.shape_cast %578 : vector<1x8x128xf32> to vector<8x128xf32>
    %580 = vector.broadcast %536 : vector<8x1xf32> to vector<8x128xf32>
    %581 = arith.mulf %580, %579 : vector<8x128xf32>
    %582 = arith.addf %577, %581 : vector<8x128xf32>
    %cst_148 = arith.constant 1.000000e+00 : f32
    %583 = vector.broadcast %cst_148 : f32 to vector<8x1xf32>
    %584 = arith.divf %583, %543 : vector<8x1xf32>
    %585 = vector.broadcast %584 : vector<8x1xf32> to vector<8x128xf32>
    %586 = arith.mulf %582, %585 : vector<8x128xf32>
    %c0_149 = arith.constant 0 : index
    %c0_150 = arith.constant 0 : index
    %587 = vector.load %arg11[%c0_149, %c0_150] : memref<8x128xf32, #tpu.memory_space<vmem>>, vector<8x128xf32>
    tpu.vector_store %arg11[%c0_149, %c0_150], %586 {strides = array<i32>} : memref<8x128xf32, #tpu.memory_space<vmem>>, vector<8x128xf32>,
    return
  }
  func.func @transform_0(%arg0: i32) -> (i32, i32, i32) {
    %c0_i32 = arith.constant 0 : i32
    %c0_i32_0 = arith.constant 0 : i32
    %c0_i32_1 = arith.constant 0 : i32
    return %c0_i32, %arg0, %c0_i32_0 : i32, i32, i32
  }
  func.func @transform_1(%arg0: i32) -> (i32, i32, i32) {
    %c0_i32 = arith.constant 0 : i32
    %c0_i32_0 = arith.constant 0 : i32
    %c0_i32_1 = arith.constant 0 : i32
    return %c0_i32, %arg0, %c0_i32_0 : i32, i32, i32
  }
  func.func @transform_2(%arg0: i32) -> (i32, i32) {
    %c0_i32 = arith.constant 0 : i32
    %c0_i32_0 = arith.constant 0 : i32
    %c0_i32_1 = arith.constant 0 : i32
    return %c0_i32, %c0_i32_0 : i32, i32
  }
  func.func @transform_3(%arg0: i32) -> (i32, i32) {
    %c0_i32 = arith.constant 0 : i32
    %c0_i32_0 = arith.constant 0 : i32
    %c0_i32_1 = arith.constant 0 : i32
    return %c0_i32, %c0_i32_0 : i32, i32
  }
  func.func @transform_4(%arg0: i32) -> (i32, i32) {
    %c0_i32 = arith.constant 0 : i32
    %c0_i32_0 = arith.constant 0 : i32
    %c0_i32_1 = arith.constant 0 : i32
    return %c0_i32, %c0_i32_0 : i32, i32
  }
  func.func @transform_5(%arg0: i32) -> (i32, i32) {
    %c0_i32 = arith.constant 0 : i32
    %c0_i32_0 = arith.constant 0 : i32
    %c0_i32_1 = arith.constant 0 : i32
    return %c0_i32, %c0_i32_0 : i32, i32
  }
  func.func @transform_6(%arg0: i32) -> (i32, i32) {
    %c0_i32 = arith.constant 0 : i32
    %c0_i32_0 = arith.constant 0 : i32
    %c0_i32_1 = arith.constant 0 : i32
    return %c0_i32, %c0_i32_0 : i32, i32
  }
  func.func @transform_7(%arg0: i32) -> (i32, i32) {
    %c0_i32 = arith.constant 0 : i32
    %c0_i32_0 = arith.constant 0 : i32
    %c0_i32_1 = arith.constant 0 : i32
    return %c0_i32, %c0_i32_0 : i32, i32
  }
  func.func @transform_8(%arg0: i32) -> (i32, i32) {
    %c0_i32 = arith.constant 0 : i32
    %c0_i32_0 = arith.constant 0 : i32
    %c0_i32_1 = arith.constant 0 : i32
    return %c0_i32, %c0_i32_0 : i32, i32
  }
  func.func @transform_9(%arg0: i32) -> i32 {
    %c0_i32 = arith.constant 0 : i32
    %c0_i32_0 = arith.constant 0 : i32
    return %c0_i32 : i32
  }
  func.func @transform_10(%arg0: i32) -> (i32, i32) {
    %c0_i32 = arith.constant 0 : i32
    %c0_i32_0 = arith.constant 0 : i32
    return %arg0, %c0_i32 : i32, i32
  }
}

</mosaic_0001>

<bundles_post_ra>
// kernel: _lambda_.1
= control target key start
LH: loop header
LB: loop body
LE: loop exit
PB: predicated region body
PF: predicated region fallthrough
CT: control target
= control target key end

     0   :  { %vm55_vm0 = vcmask 261120   ;;  %v2268_v34 = vmov 0.0   ;;  %v203_v62 = vlaneseq  ;;  %s2270_s21 = smov 64   ;;  %s2271_s22 = smov 96   ;;  %vm385_vm1 = vcmask 523264   ;;  %s2980_s2 = inlined_call_operand.vmem [shape: f32[32,32], index: 2, kind: input, shape index: {}]   ;;  %s2981_s0 = inlined_call_operand.vmem [shape: f32[8,8,32], index: 0, kind: input, shape index: {}]   ;;  %s2982_s5 = inlined_call_operand.vmem [shape: f32[64,256], index: 5, kind: input, shape index: {}]   ;;  %s2983_s4 = inlined_call_operand.vmem [shape: f32[32,256], index: 4, kind: input, shape index: {}]   ;;  %s2984_s3 = inlined_call_operand.vmem [shape: f32[1,32], index: 3, kind: input, shape index: {}]   ;;  %s2985_s6 = inlined_call_operand.vmem [shape: f32[1,256], index: 6, kind: input, shape index: {}]   ;;  %s2986_s7 = inlined_call_operand.vmem [shape: f32[32,128], index: 7, kind: input, shape index: {}]   ;;  %s2987_s8 = inlined_call_operand.vmem [shape: f32[32,128], index: 8, kind: input, shape index: {}]   ;;  %s2988_s9 = inlined_call_operand.<no memory space> [shape: f32[1], index: 9, kind: input, shape index: {}]   ;;  %s2989_s1 = inlined_call_operand.vmem [shape: f32[8,8,1], index: 1, kind: input, shape index: {}]   ;;  %s2990_s10 = inlined_call_operand.vmem [shape: f32[8,128], index: 10, kind: output, shape index: {}]  }
   0x1   :  { %v47_v0 = vld [vmem:[%s2980_s2 + $0x18] sm:$0xff]  ;;  %v46_v1 = vld [vmem:[%s2980_s2 + $0x10] sm:$0xff]  ;;  %v36_v2 = vld [vmem:[%s2981_s0] sm:$0xff]  ;;  %301 = vmatprep.mubr.f32.mxu1 %v2268_v34 }
   0x2   :  { %2047 = vmatprep.subr.mxu0 %v47_v0  ;;  %v45_v3 = vld [vmem:[%s2980_s2 + $0x8] sm:$0xff]  ;;  %2055 = vmatprep.mubr.msk.f32.mxu0 %vm55_vm0, %v36_v2  ;;  %v44_v4 = vld [vmem:[%s2980_s2] sm:$0xff]  ;;  %v2350_v6 = vld [vmem:[%s2982_s5 + $0x78] sm:$0xff]  ;;  %v204_v63 = vshrl.u32 %v203_v62, 7 }
   0x3   :  { %2048 = vmatpush3.msra.mxu0 %v47_v0  ;;  %v37_v5 = vld [vmem:[%s2981_s0 + $0x8] sm:$0xff]  ;;  %v200_v7 = vld [vmem:[%s2983_s4 + $0x38] sm:$0xff]  ;;  %v38_v8 = vld [vmem:[%s2981_s0 + $0x10] sm:$0xff] }
   0x4   :  { %2049 = vmatprep.subr.mxu0 %v46_v1  ;;  %v2361_v9 = vld [vmem:[%s2982_s5 + $0x70] sm:$0xff]  ;;  %261 = vmatprep.subr.mxu1 %v200_v7  ;;  %v2366_v10 = vld [vmem:[%s2982_s5 + $0x68] sm:$0xff]  ;;  %v2373_v11 = vld [vmem:[%s2982_s5 + $0x60] sm:$0xff]  ;;  %v205_v0 = vsub.s32 0, %v204_v63  ;;  %v209_v2 = vsub.s32 1, %v204_v63 }
   0x5   :  { %2050 = vmatpush3.msra.mxu0 %v46_v1  ;;  %v39_v12 = vld [vmem:[%s2981_s0 + $0x18] sm:$0xff]  ;;  %v40_v14 = vld [vmem:[%s2981_s0 + $0x20] sm:$0xff]  ;;  %v2392_v15 = vld [vmem:[%s2982_s5 + $0x50] sm:$0xff] }
   0x6   :  { %2051 = vmatprep.subr.mxu0 %v45_v3  ;;  %v2383_v13 = vld [vmem:[%s2982_s5 + $0x58] sm:$0xff]  ;;  %v2398_v16 = vld [vmem:[%s2982_s5 + $0x48] sm:$0xff]  ;;  %v42_v18 = vld [vmem:[%s2981_s0 + $0x30] sm:$0xff] }
   0x7   :  { %2052 = vmatpush3.msra.mxu0 %v45_v3  ;;  %v41_v17 = vld [vmem:[%s2981_s0 + $0x28] sm:$0xff]  ;;  %v43_v19 = vld [vmem:[%s2981_s0 + $0x38] sm:$0xff]  ;;  %v199_v20 = vld [vmem:[%s2983_s4 + $0x30] sm:$0xff] }
   0x8   :  { %2053 = vmatprep.subr.mxu0 %v44_v4  ;;  %v2423_v21 = vld [vmem:[%s2982_s5 + $0x40] sm:$0xff]  ;;  %262 = vmatpush1.msra.mxu1 %v199_v20  ;;  %v198_v22 = vld [vmem:[%s2983_s4 + $0x28] sm:$0xff]  ;;  %v2432_v23 = vld [vmem:[%s2982_s5 + $0x38] sm:$0xff] }
   0x9   :  { %2054 = vmatpush3.msra.mxu0 %v44_v4  ;;  %263 = vmatprep.subr.mxu1 %v198_v22  ;;  %v197_v24 = vld [vmem:[%s2983_s4 + $0x20] sm:$0xff]  ;;  %v2441_v25 = vld [vmem:[%s2982_s5 + $0x30] sm:$0xff]  ;;  %v196_v26 = vld [vmem:[%s2983_s4 + $0x18] sm:$0xff] }
   0xa   :  { %2056 = vmatmul.mubr.msk.f32.vlgmr.msra.gmra.mxu0 %vm55_vm0, %v37_v5  ;;  %405 = vmatprep.subr.mxu0 %v2350_v6  ;;  %v2450_v27 = vld [vmem:[%s2982_s5 + $0x28] sm:$0xff]  ;;  %v195_v28 = vld [vmem:[%s2983_s4 + $0x10] sm:$0xff]  ;;  %v2459_v29 = vld [vmem:[%s2982_s5 + $0x20] sm:$0xff] }
   0xb   :  { %2058 = vmatprep.mubr.msk.f32.mxu0 %vm55_vm0, %v38_v8  ;;  %406 = vmatpush1.msra.mxu0 %v2361_v9  ;;  %v194_v30 = vld [vmem:[%s2983_s4 + $0x8] sm:$0xff]  ;;  %v2468_v31 = vld [vmem:[%s2982_s5 + $0x18] sm:$0xff]  ;;  %v193_v32 = vld [vmem:[%s2983_s4] sm:$0xff] }
   0xc   :  { %407 = vmatprep.subr.mxu0 %v2366_v10  ;;  %264 = vmatpush1.msra.mxu1 %v197_v24  ;;  %v2477_v33 = vld [vmem:[%s2982_s5 + $0x10] sm:$0xff]  ;;  %v2483_v35 = vld [vmem:[%s2982_s5 + $0x8] sm:$0xff]  ;;  %v2489_v36 = vld [vmem:[%s2982_s5] sm:$0xff] }
   0xd   :  { %408 = vmatpush1.msra.mxu0 %v2373_v11  ;;  %265 = vmatprep.subr.mxu1 %v196_v26  ;;  %v1948_v38 = vld [vmem:[%s2984_s3] ss:$0 sm:$0xff] }
   0xe   :  { %2059 = vmatmul.mubr.msk.f32.gmra.mxu0 %vm55_vm0, %v39_v12  ;;  %409 = vmatprep.subr.mxu0 %v2383_v13  ;;  %v201_v1 = vld [vmem:[%s2985_s6] sm:$0x3]  ;;  %s2269_s6 = smov 32  }
   0xf   :  { %2061 = vmatprep.mubr.msk.f32.mxu0 %vm55_vm0, %v40_v14  ;;  %410 = vmatpush1.msra.mxu0 %v2392_v15  ;;  %v206_v3 = vrot.slane %v201_v1, %v205_v0  ;;  %v210_v4 = vrot.slane %v201_v1, %v209_v2 }
  0x10   :  { %411 = vmatprep.subr.mxu0 %v2398_v16  ;;  %266 = vmatpush1.msra.mxu1 %v195_v28 }
  0x11   :  { %412 = vmatpush1.msra.mxu0 %v2423_v21  ;;  %267 = vmatprep.subr.mxu1 %v194_v30 }
  0x12   :  { %2062 = vmatmul.mubr.msk.f32.gmra.mxu0 %vm55_vm0, %v41_v17  ;;  %413 = vmatprep.subr.mxu0 %v2432_v23 }
  0x13   :  { %2064 = vmatprep.mubr.msk.f32.mxu0 %vm55_vm0, %v42_v18  ;;  %414 = vmatpush1.msra.mxu0 %v2441_v25 }
  0x14   :  { %415 = vmatprep.subr.mxu0 %v2450_v27  ;;  %268 = vmatpush1.msra.mxu1 %v193_v32 }
  0x15   :  { %416 = vmatpush1.msra.mxu0 %v2459_v29  ;;  %692 = vmatprep.subr.mxu1 %v2350_v6 }
  0x16   :  { %2065 = vmatmul.mubr.msk.f32.gmra.mxu0 %vm55_vm0, %v43_v19  ;;  %417 = vmatprep.subr.mxu0 %v2468_v31 }
  0x17   :  { %418 = vmatpush1.msra.mxu0 %v2477_v33  ;;  %453 = vmatprep.mubr.f32.mxu0 %v2268_v34 }
  0x18   :  { %419 = vmatprep.subr.mxu0 %v2483_v35 }
  0x19   :  { %420 = vmatpush1.msra.mxu0 %v2489_v36 }
  0x1a   :  { %454 = vmatmul.mubr.f32.vlgmr.msra.gmra.mxu0 %v2268_v34  ;;  %548 = vmatprep.subr.mxu0 %v2350_v6 }
  0x1b   :  { %549 = vmatpush1.msra.mxu0 %v2361_v9  ;;  %596 = vmatprep.mubr.f32.mxu0 %v2268_v34 }
  0x1c   :  { %550 = vmatprep.subr.mxu0 %v2366_v10 }
  0x1d   :  { %551 = vmatpush1.msra.mxu0 %v2373_v11 }
  0x1e   :  { %552 = vmatprep.subr.mxu0 %v2383_v13 }
  0x1f   :  { %553 = vmatpush1.msra.mxu0 %v2392_v15 }
  0x20   :  { %554 = vmatprep.subr.mxu0 %v2398_v16 }
  0x21   :  { %555 = vmatpush1.msra.mxu0 %v2423_v21 }
  0x22   :  { %556 = vmatprep.subr.mxu0 %v2432_v23 }
  0x23   :  { %557 = vmatpush1.msra.mxu0 %v2441_v25 }
  0x24   :  { %558 = vmatprep.subr.mxu0 %v2450_v27 }
  0x25   :  { %559 = vmatpush1.msra.mxu0 %v2459_v29 }
  0x26   :  { %560 = vmatprep.subr.mxu0 %v2468_v31 }
  0x27   :  { %561 = vmatpush1.msra.mxu0 %v2477_v33 }
  0x28   :  { %562 = vmatprep.subr.mxu0 %v2483_v35 }
  0x29   :  { %563 = vmatpush1.msra.mxu0 %v2489_v36 }
  0x2a   :  { %836 = vmatprep.subr.mxu0 %v2350_v6 }
  0xca   :  { %v2057_v37 = vpop.f32.mrf.mxu0 }
  0xcb   :  { %v152_v42 = vadd.f32 %v2057_v37, %v1948_v38 }
  0xcc   :  { %v146_v39 = vpop.f32.mrf.mxu0 }
  0xcd   :  { %v147_v40 = vadd.f32 %v1948_v38, %v146_v39  ;;  %v186_v45 = vmax.f32 %v152_v42, 0.0 }
  0xce   :  { %v2060_v41 = vpop.f32.mrf.mxu0 }
  0xcf   :  { %v185_v43 = vmax.f32 %v147_v40, 0.0  ;;  %v162_v48 = vadd.f32 %v2060_v41, %v1948_v38 }
  0xd0   :  { %v156_v44 = vpop.f32.mrf.mxu0 }
  0xd1   :  { %1957 = vmatmul.mubr.msk.f32.vlgmr.msra.gmra.mxu1 %vm55_vm0, %v185_v43  ;;  %v157_v46 = vadd.f32 %v1948_v38, %v156_v44  ;;  %v188_v51 = vmax.f32 %v162_v48, 0.0 }
  0xd2   :  { %307 = vmatprep.mubr.f32.mxu1 %v2268_v34  ;;  %693 = vmatpush1.msra.mxu1 %v2361_v9  ;;  %v2063_v47 = vpop.f32.mrf.mxu0 }
  0xd3   :  { %694 = vmatprep.subr.mxu1 %v2366_v10  ;;  %v187_v49 = vmax.f32 %v157_v46, 0.0  ;;  %v172_v54 = vadd.f32 %v2063_v47, %v1948_v38 }
  0xd4   :  { %695 = vmatpush1.msra.mxu1 %v2373_v11  ;;  %v166_v50 = vpop.f32.mrf.mxu0 }
  0xd5   :  { %1958 = vmatmul.mubr.msk.f32.gmra.mxu1 %vm55_vm0, %v186_v45  ;;  %696 = vmatprep.subr.mxu1 %v2383_v13  ;;  %v167_v52 = vadd.f32 %v1948_v38, %v166_v50  ;;  %v190_v57 = vmax.f32 %v172_v54, 0.0 }
  0xd6   :  { %313 = vmatprep.mubr.f32.mxu1 %v2268_v34  ;;  %697 = vmatpush1.msra.mxu1 %v2392_v15  ;;  %v2066_v53 = vpop.f32.mrf.mxu0 }
  0xd7   :  { %698 = vmatprep.subr.mxu1 %v2398_v16  ;;  %v189_v55 = vmax.f32 %v167_v52, 0.0  ;;  %v182_v59 = vadd.f32 %v2066_v53, %v1948_v38 }
  0xd8   :  { %699 = vmatpush1.msra.mxu1 %v2423_v21  ;;  %v176_v56 = vpop.f32.mrf.mxu0 }
  0xd9   :  { %1959 = vmatmul.mubr.msk.f32.gmra.mxu1 %vm55_vm0, %v187_v49  ;;  %700 = vmatprep.subr.mxu1 %v2432_v23  ;;  %v177_v58 = vadd.f32 %v1948_v38, %v176_v56  ;;  %v192_v61 = vmax.f32 %v182_v59, 0.0 }
  0xda   :  { %319 = vmatprep.mubr.f32.mxu1 %v2268_v34  ;;  %701 = vmatpush1.msra.mxu1 %v2441_v25  ;;  %v455_v7 = vpop.f32.mrf.mxu0 }
  0xdb   :  { %702 = vmatprep.subr.mxu1 %v2450_v27  ;;  %v191_v60 = vmax.f32 %v177_v58, 0.0 }
  0xdc   :  { %703 = vmatpush1.msra.mxu1 %v2459_v29 }
  0xdd   :  { %1960 = vmatmul.mubr.msk.f32.gmra.mxu1 %vm55_vm0, %v188_v51  ;;  %704 = vmatprep.subr.mxu1 %v2468_v31 }
  0xde   :  { %325 = vmatprep.mubr.f32.mxu1 %v2268_v34  ;;  %705 = vmatpush1.msra.mxu1 %v2477_v33 }
  0xdf   :  { %706 = vmatprep.subr.mxu1 %v2483_v35 }
  0xe0   :  { %707 = vmatpush1.msra.mxu1 %v2489_v36 }
  0xe1   :  { %1961 = vmatmul.mubr.msk.f32.gmra.mxu1 %vm55_vm0, %v189_v55  ;;  %980 = vmatprep.subr.mxu1 %v2350_v6 }
  0xe2   :  { %331 = vmatprep.mubr.f32.mxu1 %v2268_v34 }
  0xe5   :  { %1962 = vmatmul.mubr.msk.f32.gmra.mxu1 %vm55_vm0, %v190_v57  ;;  %v457_v57 = vpop.f32.mrf.mxu0 }
  0xe6   :  { %337 = vmatprep.mubr.f32.mxu1 %v2268_v34 }
  0xe9   :  { %1963 = vmatmul.mubr.msk.f32.gmra.mxu1 %vm55_vm0, %v191_v60 }
  0xea   :  { %343 = vmatprep.mubr.f32.mxu1 %v2268_v34 }
  0xed   :  { %1964 = vmatmul.mubr.msk.f32.gmra.mxu1 %vm55_vm0, %v192_v61 }
  0xee   :  { %740 = vmatprep.mubr.f32.mxu1 %v2268_v34 }
 0x191   :  { %v303_v5 = vpop.f32.mrf.mxu1 }
 0x192   :  { %v304_v8 = vadd.f32 %v303_v5, %v206_v3 }
 0x193   :  { %v305_v12 = vpop.f32.mrf.mxu1 }
 0x194   :  { %v2552_v14 = vadd.f32 %v305_v12, %v210_v4  ;;  %v460_v17 = vadd.f32 %v455_v7, %v304_v8 }
 0x195   :  { %v309_v18 = vpop.f32.mrf.mxu1 }
 0x196   :  { %2122 = vtanh.f32 %v460_v17  ;;  %v2554_v19 = vadd.f32 %v309_v18, %v206_v3  ;;  %v1965_v60 = vmul.f32 -1.442695, %v460_v17 }
 0x197   :  { %v311_v20 = vpop.f32.mrf.mxu1 }
 0x198   :  { %v2556_v22 = vadd.f32 %v311_v20, %v210_v4 }
 0x199   :  { %v315_v24 = vpop.f32.mrf.mxu1 }
 0x19a   :  { %v2558_v26 = vadd.f32 %v315_v24, %v206_v3 }
 0x19b   :  { %v317_v28 = vpop.f32.mrf.mxu1 }
 0x19c   :  { %v2560_v30 = vadd.f32 %v317_v28, %v210_v4 }
 0x19d   :  { %v321_v32 = vpop.f32.mrf.mxu1 }
 0x19e   :  { %v2562_v37 = vadd.f32 %v321_v32, %v206_v3 }
 0x19f   :  { %v323_v38 = vpop.f32.mrf.mxu1 }
 0x1a0   :  { %v2564_v39 = vadd.f32 %v323_v38, %v210_v4 }
 0x1a1   :  { %v327_v40 = vpop.f32.mrf.mxu1 }
 0x1a2   :  { %v2566_v41 = vadd.f32 %v327_v40, %v206_v3 }
 0x1a3   :  { %v2123_v42 = vpop.eup %2122  ;;  %v329_v43 = vpop.f32.mrf.mxu1 }
 0x1a4   :  { %v2568_v44 = vadd.f32 %v329_v43, %v210_v4  ;;  %471 = vrot.lane.b32.xlu0 %v2123_v42, %s2269_s6 }
 0x1a5   :  { %v333_v45 = vpop.f32.mrf.mxu1 }
 0x1a6   :  { %v2571_v46 = vadd.f32 %v333_v45, %v206_v3 }
 0x1a7   :  { %v335_v47 = vpop.f32.mrf.mxu1 }
 0x1a8   :  { %v2573_v48 = vadd.f32 %v335_v47, %v210_v4 }
 0x1a9   :  { %v339_v49 = vpop.f32.mrf.mxu1 }
 0x1aa   :  { %v2575_v50 = vadd.f32 %v339_v49, %v206_v3 }
 0x1ab   :  { %v341_v51 = vpop.f32.mrf.mxu1 }
 0x1ac   :  { %v2577_v52 = vadd.f32 %v341_v51, %v210_v4 }
 0x1ad   :  { %v345_v53 = vpop.f32.mrf.mxu1 }
 0x1ae   :  { %v2579_v54 = vadd.f32 %v345_v53, %v206_v3 }
 0x1af   :  { %v347_v55 = vpop.f32.mrf.mxu1 }
 0x1b0   :  { %v348_v56 = vadd.f32 %v347_v55, %v210_v4 }
 0x1b2   :  { %v461_v58 = vadd.f32 %v457_v57, %v348_v56 }
 0x1b4   :  { %2124 = vtanh.f32 %v461_v58  ;;  %v1966_v63 = vmul.f32 -1.442695, %v461_v58 }
 0x1b5   :  { %2126 = vpow2.f32 %v1965_v60 }
 0x1c1   :  { %v2125_v59 = vpop.eup %2124 }
 0x1c2   :  { %495 = vrot.lane.b32.xlu0 %v2125_v59, %s2269_s6  ;;  %v2127_v61 = vpop.eup %2126 }
 0x1c3   :  { %v465_v62 = vadd.f32 1.0, %v2127_v61 }
 0x1c5   :  { %2128 = vrcp.f32 %v465_v62 }
 0x1c6   :  { %2130 = vpow2.f32 %v1966_v63 }
 0x1d2   :  { %v2129_v0 = vpop.eup %2128 }
 0x1d3   :  { %v2131_v3 = vpop.eup %2130  ;;  %v469_v12 = vmul.f32 0.0, %v2129_v0 }
 0x1d4   :  { %v489_v4 = vadd.f32 1.0, %v2131_v3 }
 0x1d6   :  { %2132 = vrcp.f32 %v489_v4 }
 0x1e3   :  { %v2133_v5 = vpop.eup %2132 }
 0x1e4   :  { %v493_v24 = vmul.f32 0.0, %v2133_v5 }
 0x216   :  { %v472_v1 = vpop.permute.xlu0 %471 }
 0x217   :  { %v474_v2 = vmul.f32 %v2129_v0, %v472_v1 }
 0x219   :  { %476 = vrot.lane.b32.xlu1 %v474_v2, %s2269_s6 }
 0x234   :  { %v496_v7 = vpop.permute.xlu0 %495 }
 0x235   :  { %v498_v8 = vmul.f32 %v2133_v5, %v496_v7 }
 0x237   :  { %500 = vrot.lane.b32.xlu1 %v498_v8, %s2269_s6 }
 0x28b   :  { %v477_v17 = vpop.permute.xlu1 %476 }
 0x28c   :  { %v2584_v18 = vadd.f32 %v477_v17, %v469_v12 }
 0x28e   :  { %2134 = vtanh.f32 %v2584_v18 }
 0x29b   :  { %v2135_v20 = vpop.eup %2134 }
 0x29c   :  { %482 = vrot.lane.b32.xlu0 %v2135_v20, %s2269_s6 }
 0x2a9   :  { %v501_v28 = vpop.permute.xlu1 %500 }
 0x2aa   :  { %v2588_v32 = vadd.f32 %v501_v28, %v493_v24 }
 0x2ac   :  { %2136 = vtanh.f32 %v2588_v32 }
 0x2b9   :  { %v2137_v38 = vpop.eup %2136 }
 0x2ba   :  { %506 = vrot.lane.b32.xlu1 %v2137_v38, %s2269_s6 }
 0x30e   :  { %v483_v40 = vpop.permute.xlu0 %482 }
 0x30f   :  { %v485_v42 = vmul.f32 %v2129_v0, %v483_v40 }
 0x311   :  { %511 = vrot.lane.b32.xlu0 %v485_v42, %s2270_s21 }
 0x32c   :  { %v507_v43 = vpop.permute.xlu1 %506 }
 0x32d   :  { %v2593_v45 = vmul.f32 %v2133_v5, %v507_v43 }
 0x32f   :  { %521 = vrot.lane.b32.xlu1 %v2593_v45, %s2271_s22 }
 0x383   :  { %v512_v47 = vpop.permute.xlu0 %511 }
 0x384   :  { %514 = vst.msk [vmem:[#allocation4] sm:$0xff] %vm55_vm0, %v512_v47 }
 0x3a1   :  { %v522_v49 = vpop.permute.xlu1 %521 }
 0x3a2   :  { %v524_v51 = vsel %vm55_vm0, %v512_v47, %v522_v49 }
 0x3a3   :  { %1967 = vmatmul.mubr.msk.f32.vlgmr.msra.gmra.mxu0 %vm385_vm1, %v524_v51 }
 0x3a4   :  { %837 = vmatpush1.msra.mxu0 %v2361_v9  ;;  %884 = vmatprep.mubr.f32.mxu0 %v2268_v34 }
 0x3a5   :  { %838 = vmatprep.subr.mxu0 %v2366_v10 }
 0x3a6   :  { %839 = vmatpush1.msra.mxu0 %v2373_v11 }
 0x3a7   :  { %840 = vmatprep.subr.mxu0 %v2383_v13 }
 0x3a8   :  { %841 = vmatpush1.msra.mxu0 %v2392_v15 }
 0x3a9   :  { %842 = vmatprep.subr.mxu0 %v2398_v16 }
 0x3aa   :  { %843 = vmatpush1.msra.mxu0 %v2423_v21 }
 0x3ab   :  { %844 = vmatprep.subr.mxu0 %v2432_v23 }
 0x3ac   :  { %845 = vmatpush1.msra.mxu0 %v2441_v25 }
 0x3ad   :  { %846 = vmatprep.subr.mxu0 %v2450_v27 }
 0x3ae   :  { %847 = vmatpush1.msra.mxu0 %v2459_v29 }
 0x3af   :  { %848 = vmatprep.subr.mxu0 %v2468_v31 }
 0x3b0   :  { %849 = vmatpush1.msra.mxu0 %v2477_v33 }
 0x3b1   :  { %850 = vmatprep.subr.mxu0 %v2483_v35 }
 0x3b2   :  { %851 = vmatpush1.msra.mxu0 %v2489_v36 }
 0x3b3   :  { %1124 = vmatprep.subr.mxu0 %v2350_v6 }
 0x463   :  { %v598_v53 = vpop.f32.mrf.mxu0 }
 0x464   :  { %v603_v55 = vadd.f32 %v598_v53, %v2554_v19 }
 0x465   :  { %v600_v56 = vpop.f32.mrf.mxu0 }
 0x466   :  { %2138 = vtanh.f32 %v603_v55  ;;  %v604_v57 = vadd.f32 %v600_v56, %v2577_v52  ;;  %v1968_v60 = vmul.f32 -1.442695, %v603_v55 }
 0x468   :  { %2140 = vtanh.f32 %v604_v57  ;;  %v1969_v61 = vmul.f32 -1.442695, %v604_v57 }
 0x469   :  { %2142 = vpow2.f32 %v1968_v60 }
 0x46a   :  { %2144 = vpow2.f32 %v1969_v61 }
 0x473   :  { %v2139_v58 = vpop.eup %2138 }
 0x474   :  { %614 = vrot.lane.b32.xlu0 %v2139_v58, %s2269_s6 }
 0x475   :  { %v2141_v59 = vpop.eup %2140 }
 0x476   :  { %638 = vrot.lane.b32.xlu1 %v2141_v59, %s2269_s6  ;;  %v2143_v62 = vpop.eup %2142 }
 0x477   :  { %v2145_v63 = vpop.eup %2144  ;;  %v608_v0 = vadd.f32 1.0, %v2143_v62 }
 0x478   :  { %v632_v1 = vadd.f32 1.0, %v2145_v63 }
 0x479   :  { %2146 = vrcp.f32 %v608_v0 }
 0x47a   :  { %2148 = vrcp.f32 %v632_v1 }
 0x486   :  { %v2147_v19 = vpop.eup %2146 }
 0x487   :  { %v2149_v3 = vpop.eup %2148  ;;  %v612_v7 = vmul.f32 %v2147_v19, %v2584_v18 }
 0x488   :  { %v636_v17 = vmul.f32 %v2149_v3, %v2588_v32 }
 0x4e6   :  { %v615_v2 = vpop.permute.xlu0 %614 }
 0x4e7   :  { %v617_v52 = vmul.f32 %v2147_v19, %v615_v2 }
 0x4e8   :  { %v639_v4 = vpop.permute.xlu1 %638 }
 0x4e9   :  { %619 = vrot.lane.b32.xlu0 %v617_v52, %s2269_s6  ;;  %v641_v5 = vmul.f32 %v2149_v3, %v639_v4 }
 0x4eb   :  { %643 = vrot.lane.b32.xlu1 %v641_v5, %s2269_s6 }
 0x55b   :  { %v620_v8 = vpop.permute.xlu0 %619 }
 0x55c   :  { %v2624_v12 = vadd.f32 %v620_v8, %v612_v7 }
 0x55d   :  { %v644_v20 = vpop.permute.xlu1 %643 }
 0x55e   :  { %2150 = vtanh.f32 %v2624_v12  ;;  %v2628_v24 = vadd.f32 %v644_v20, %v636_v17 }
 0x560   :  { %2152 = vtanh.f32 %v2628_v24 }
 0x56b   :  { %v2151_v28 = vpop.eup %2150 }
 0x56c   :  { %625 = vrot.lane.b32.xlu0 %v2151_v28, %s2269_s6 }
 0x56d   :  { %v2153_v38 = vpop.eup %2152 }
 0x56e   :  { %649 = vrot.lane.b32.xlu1 %v2153_v38, %s2269_s6 }
 0x5de   :  { %v626_v40 = vpop.permute.xlu0 %625 }
 0x5df   :  { %v628_v18 = vmul.f32 %v2147_v19, %v626_v40 }
 0x5e0   :  { %v650_v42 = vpop.permute.xlu1 %649 }
 0x5e1   :  { %654 = vrot.lane.b32.xlu0 %v628_v18, %s2270_s21  ;;  %v2634_v43 = vmul.f32 %v2149_v3, %v650_v42 }
 0x5e3   :  { %665 = vrot.lane.b32.xlu1 %v2634_v43, %s2271_s22 }
 0x653   :  { %v655_v32 = vpop.permute.xlu0 %654 }
 0x654   :  { %658 = vst.msk [vmem:[#allocation4 + $0x8] sm:$0xff] %vm55_vm0, %v655_v32 }
 0x655   :  { %v666_v47 = vpop.permute.xlu1 %665 }
 0x656   :  { %v668_v49 = vsel %vm55_vm0, %v655_v32, %v666_v47 }
 0x657   :  { %1970 = vmatmul.mubr.msk.f32.vlgmr.msra.gmra.mxu1 %vm385_vm1, %v668_v49 }
 0x658   :  { %981 = vmatpush1.msra.mxu1 %v2361_v9  ;;  %1028 = vmatprep.mubr.f32.mxu1 %v2268_v34 }
 0x659   :  { %982 = vmatprep.subr.mxu1 %v2366_v10 }
 0x65a   :  { %983 = vmatpush1.msra.mxu1 %v2373_v11 }
 0x65b   :  { %984 = vmatprep.subr.mxu1 %v2383_v13 }
 0x65c   :  { %985 = vmatpush1.msra.mxu1 %v2392_v15 }
 0x65d   :  { %986 = vmatprep.subr.mxu1 %v2398_v16 }
 0x65e   :  { %987 = vmatpush1.msra.mxu1 %v2423_v21 }
 0x65f   :  { %988 = vmatprep.subr.mxu1 %v2432_v23 }
 0x660   :  { %989 = vmatpush1.msra.mxu1 %v2441_v25 }
 0x661   :  { %990 = vmatprep.subr.mxu1 %v2450_v27 }
 0x662   :  { %991 = vmatpush1.msra.mxu1 %v2459_v29 }
 0x663   :  { %992 = vmatprep.subr.mxu1 %v2468_v31 }
 0x664   :  { %993 = vmatpush1.msra.mxu1 %v2477_v33 }
 0x665   :  { %994 = vmatprep.subr.mxu1 %v2483_v35 }
 0x666   :  { %995 = vmatpush1.msra.mxu1 %v2489_v36 }
 0x667   :  { %1268 = vmatprep.subr.mxu1 %v2350_v6 }
 0x717   :  { %v742_v51 = vpop.f32.mrf.mxu1 }
 0x718   :  { %v747_v53 = vadd.f32 %v742_v51, %v2558_v26 }
 0x719   :  { %v744_v55 = vpop.f32.mrf.mxu1 }
 0x71a   :  { %2154 = vtanh.f32 %v747_v53  ;;  %v748_v56 = vadd.f32 %v744_v55, %v2573_v48  ;;  %v1971_v59 = vmul.f32 -1.442695, %v747_v53 }
 0x71c   :  { %2156 = vtanh.f32 %v748_v56  ;;  %v1972_v60 = vmul.f32 -1.442695, %v748_v56 }
 0x71d   :  { %2158 = vpow2.f32 %v1971_v59 }
 0x71e   :  { %2160 = vpow2.f32 %v1972_v60 }
 0x727   :  { %v2155_v57 = vpop.eup %2154 }
 0x728   :  { %758 = vrot.lane.b32.xlu0 %v2155_v57, %s2269_s6 }
 0x729   :  { %v2157_v58 = vpop.eup %2156 }
 0x72a   :  { %782 = vrot.lane.b32.xlu1 %v2157_v58, %s2269_s6  ;;  %v2159_v61 = vpop.eup %2158 }
 0x72b   :  { %v2161_v62 = vpop.eup %2160  ;;  %v752_v63 = vadd.f32 1.0, %v2159_v61 }
 0x72c   :  { %v776_v0 = vadd.f32 1.0, %v2161_v62 }
 0x72d   :  { %2162 = vrcp.f32 %v752_v63 }
 0x72e   :  { %2164 = vrcp.f32 %v776_v0 }
 0x73a   :  { %v2163_v26 = vpop.eup %2162 }
 0x73b   :  { %v2165_v19 = vpop.eup %2164  ;;  %v756_v3 = vmul.f32 %v2163_v26, %v2624_v12 }
 0x73c   :  { %v780_v7 = vmul.f32 %v2165_v19, %v2628_v24 }
 0x79a   :  { %v759_v1 = vpop.permute.xlu0 %758 }
 0x79b   :  { %v761_v48 = vmul.f32 %v2163_v26, %v759_v1 }
 0x79c   :  { %v783_v2 = vpop.permute.xlu1 %782 }
 0x79d   :  { %763 = vrot.lane.b32.xlu0 %v761_v48, %s2269_s6  ;;  %v785_v52 = vmul.f32 %v2165_v19, %v783_v2 }
 0x79f   :  { %787 = vrot.lane.b32.xlu1 %v785_v52, %s2269_s6 }
 0x80f   :  { %v764_v4 = vpop.permute.xlu0 %763 }
 0x810   :  { %v2665_v5 = vadd.f32 %v764_v4, %v756_v3 }
 0x811   :  { %v788_v8 = vpop.permute.xlu1 %787 }
 0x812   :  { %2166 = vtanh.f32 %v2665_v5  ;;  %v2669_v17 = vadd.f32 %v788_v8, %v780_v7 }
 0x814   :  { %2168 = vtanh.f32 %v2669_v17 }
 0x81f   :  { %v2167_v20 = vpop.eup %2166 }
 0x820   :  { %769 = vrot.lane.b32.xlu0 %v2167_v20, %s2269_s6 }
 0x821   :  { %v2169_v28 = vpop.eup %2168 }
 0x822   :  { %793 = vrot.lane.b32.xlu1 %v2169_v28, %s2269_s6 }
 0x892   :  { %v770_v38 = vpop.permute.xlu0 %769 }
 0x893   :  { %v772_v12 = vmul.f32 %v2163_v26, %v770_v38 }
 0x894   :  { %v794_v40 = vpop.permute.xlu1 %793 }
 0x895   :  { %798 = vrot.lane.b32.xlu0 %v772_v12, %s2270_s21  ;;  %v2675_v18 = vmul.f32 %v2165_v19, %v794_v40 }
 0x897   :  { %809 = vrot.lane.b32.xlu1 %v2675_v18, %s2271_s22 }
 0x907   :  { %v799_v24 = vpop.permute.xlu0 %798 }
 0x908   :  { %802 = vst.msk [vmem:[#allocation4 + $0x10] sm:$0xff] %vm55_vm0, %v799_v24 }
 0x909   :  { %v810_v42 = vpop.permute.xlu1 %809 }
 0x90a   :  { %v812_v32 = vsel %vm55_vm0, %v799_v24, %v810_v42 }
 0x90b   :  { %1973 = vmatmul.mubr.msk.f32.vlgmr.msra.gmra.mxu0 %vm385_vm1, %v812_v32 }
 0x90c   :  { %1125 = vmatpush1.msra.mxu0 %v2361_v9  ;;  %1172 = vmatprep.mubr.f32.mxu0 %v2268_v34 }
 0x90d   :  { %1126 = vmatprep.subr.mxu0 %v2366_v10 }
 0x90e   :  { %1127 = vmatpush1.msra.mxu0 %v2373_v11 }
 0x90f   :  { %1128 = vmatprep.subr.mxu0 %v2383_v13 }
 0x910   :  { %1129 = vmatpush1.msra.mxu0 %v2392_v15 }
 0x911   :  { %1130 = vmatprep.subr.mxu0 %v2398_v16 }
 0x912   :  { %1131 = vmatpush1.msra.mxu0 %v2423_v21 }
 0x913   :  { %1132 = vmatprep.subr.mxu0 %v2432_v23 }
 0x914   :  { %1133 = vmatpush1.msra.mxu0 %v2441_v25 }
 0x915   :  { %1134 = vmatprep.subr.mxu0 %v2450_v27 }
 0x916   :  { %1135 = vmatpush1.msra.mxu0 %v2459_v29 }
 0x917   :  { %1136 = vmatprep.subr.mxu0 %v2468_v31 }
 0x918   :  { %1137 = vmatpush1.msra.mxu0 %v2477_v33 }
 0x919   :  { %1138 = vmatprep.subr.mxu0 %v2483_v35 }
 0x91a   :  { %1139 = vmatpush1.msra.mxu0 %v2489_v36 }
 0x91b   :  { %1411 = vmatprep.subr.mxu0 %v2350_v6 }
 0x9cb   :  { %v886_v47 = vpop.f32.mrf.mxu0 }
 0x9cc   :  { %v891_v49 = vadd.f32 %v886_v47, %v2562_v37 }
 0x9cd   :  { %v888_v51 = vpop.f32.mrf.mxu0 }
 0x9ce   :  { %2170 = vtanh.f32 %v891_v49  ;;  %v892_v53 = vadd.f32 %v888_v51, %v2568_v44  ;;  %v1974_v57 = vmul.f32 -1.442695, %v891_v49 }
 0x9d0   :  { %2172 = vtanh.f32 %v892_v53  ;;  %v1975_v58 = vmul.f32 -1.442695, %v892_v53 }
 0x9d1   :  { %2174 = vpow2.f32 %v1974_v57 }
 0x9d2   :  { %2176 = vpow2.f32 %v1975_v58 }
 0x9db   :  { %v2171_v55 = vpop.eup %2170 }
 0x9dc   :  { %902 = vrot.lane.b32.xlu0 %v2171_v55, %s2269_s6 }
 0x9dd   :  { %v2173_v56 = vpop.eup %2172 }
 0x9de   :  { %926 = vrot.lane.b32.xlu1 %v2173_v56, %s2269_s6  ;;  %v2175_v59 = vpop.eup %2174 }
 0x9df   :  { %v2177_v6 = vpop.eup %2176  ;;  %v896_v60 = vadd.f32 1.0, %v2175_v59 }
 0x9e0   :  { %v920_v61 = vadd.f32 1.0, %v2177_v6 }
 0x9e1   :  { %2178 = vrcp.f32 %v896_v60 }
 0x9e2   :  { %2180 = vrcp.f32 %v920_v61 }
 0x9ee   :  { %v2179_v37 = vpop.eup %2178 }
 0x9ef   :  { %v2181_v63 = vpop.eup %2180  ;;  %v900_v1 = vmul.f32 %v2179_v37, %v2665_v5 }
 0x9f0   :  { %v924_v2 = vmul.f32 %v2181_v63, %v2669_v17 }
 0xa4e   :  { %v903_v62 = vpop.permute.xlu0 %902 }
 0xa4f   :  { %v905_v44 = vmul.f32 %v2179_v37, %v903_v62 }
 0xa50   :  { %v927_v0 = vpop.permute.xlu1 %926 }
 0xa51   :  { %907 = vrot.lane.b32.xlu0 %v905_v44, %s2269_s6  ;;  %v929_v26 = vmul.f32 %v2181_v63, %v927_v0 }
 0xa53   :  { %931 = vrot.lane.b32.xlu1 %v929_v26, %s2269_s6 }
 0xac3   :  { %v908_v48 = vpop.permute.xlu0 %907 }
 0xac4   :  { %v2706_v19 = vadd.f32 %v908_v48, %v900_v1 }
 0xac5   :  { %v932_v52 = vpop.permute.xlu1 %931 }
 0xac6   :  { %2182 = vtanh.f32 %v2706_v19  ;;  %v2710_v3 = vadd.f32 %v932_v52, %v924_v2 }
 0xac8   :  { %2184 = vtanh.f32 %v2710_v3 }
 0xad3   :  { %v2183_v4 = vpop.eup %2182 }
 0xad4   :  { %913 = vrot.lane.b32.xlu0 %v2183_v4, %s2269_s6 }
 0xad5   :  { %v2185_v7 = vpop.eup %2184 }
 0xad6   :  { %937 = vrot.lane.b32.xlu1 %v2185_v7, %s2269_s6 }
 0xb46   :  { %v914_v8 = vpop.permute.xlu0 %913 }
 0xb47   :  { %v916_v5 = vmul.f32 %v2179_v37, %v914_v8 }
 0xb48   :  { %v938_v20 = vpop.permute.xlu1 %937 }
 0xb49   :  { %942 = vrot.lane.b32.xlu0 %v916_v5, %s2270_s21  ;;  %v2716_v28 = vmul.f32 %v2181_v63, %v938_v20 }
 0xb4b   :  { %953 = vrot.lane.b32.xlu1 %v2716_v28, %s2271_s22 }
 0xbbb   :  { %v943_v17 = vpop.permute.xlu0 %942 }
 0xbbc   :  { %946 = vst.msk [vmem:[#allocation4 + $0x18] sm:$0xff] %vm55_vm0, %v943_v17 }
 0xbbd   :  { %v954_v38 = vpop.permute.xlu1 %953 }
 0xbbe   :  { %v956_v12 = vsel %vm55_vm0, %v943_v17, %v954_v38 }
 0xbbf   :  { %1976 = vmatmul.mubr.msk.f32.vlgmr.msra.gmra.mxu1 %vm385_vm1, %v956_v12 }
 0xbc0   :  { %1269 = vmatpush1.msra.mxu1 %v2361_v9  ;;  %1316 = vmatprep.mubr.f32.mxu1 %v2268_v34 }
 0xbc1   :  { %1270 = vmatprep.subr.mxu1 %v2366_v10 }
 0xbc2   :  { %1271 = vmatpush1.msra.mxu1 %v2373_v11 }
 0xbc3   :  { %1272 = vmatprep.subr.mxu1 %v2383_v13 }
 0xbc4   :  { %1273 = vmatpush1.msra.mxu1 %v2392_v15 }
 0xbc5   :  { %1274 = vmatprep.subr.mxu1 %v2398_v16 }
 0xbc6   :  { %1275 = vmatpush1.msra.mxu1 %v2423_v21 }
 0xbc7   :  { %1276 = vmatprep.subr.mxu1 %v2432_v23 }
 0xbc8   :  { %1277 = vmatpush1.msra.mxu1 %v2441_v25 }
 0xbc9   :  { %1278 = vmatprep.subr.mxu1 %v2450_v27 }
 0xbca   :  { %1279 = vmatpush1.msra.mxu1 %v2459_v29 }
 0xbcb   :  { %1280 = vmatprep.subr.mxu1 %v2468_v31 }
 0xbcc   :  { %1281 = vmatpush1.msra.mxu1 %v2477_v33 }
 0xbcd   :  { %1282 = vmatprep.subr.mxu1 %v2483_v35 }
 0xbce   :  { %1283 = vmatpush1.msra.mxu1 %v2489_v36 }
 0xc7f   :  { %v1030_v40 = vpop.f32.mrf.mxu1 }
 0xc80   :  { %v1035_v24 = vadd.f32 %v1030_v40, %v2566_v41 }
 0xc81   :  { %v1032_v42 = vpop.f32.mrf.mxu1 }
 0xc82   :  { %2186 = vtanh.f32 %v1035_v24  ;;  %v1036_v32 = vadd.f32 %v1032_v42, %v2564_v39  ;;  %v1977_v51 = vmul.f32 -1.442695, %v1035_v24 }
 0xc84   :  { %2188 = vtanh.f32 %v1036_v32  ;;  %v1978_v53 = vmul.f32 -1.442695, %v1036_v32 }
 0xc85   :  { %2190 = vpow2.f32 %v1977_v51 }
 0xc86   :  { %2192 = vpow2.f32 %v1978_v53 }
 0xc8f   :  { %v2187_v47 = vpop.eup %2186 }
 0xc90   :  { %1046 = vrot.lane.b32.xlu0 %v2187_v47, %s2269_s6 }
 0xc91   :  { %v2189_v49 = vpop.eup %2188 }
 0xc92   :  { %1070 = vrot.lane.b32.xlu1 %v2189_v49, %s2269_s6  ;;  %v2191_v55 = vpop.eup %2190 }
 0xc93   :  { %v2193_v56 = vpop.eup %2192  ;;  %v1040_v57 = vadd.f32 1.0, %v2191_v55 }
 0xc94   :  { %v1064_v58 = vadd.f32 1.0, %v2193_v56 }
 0xc95   :  { %2194 = vrcp.f32 %v1040_v57 }
 0xc96   :  { %2196 = vrcp.f32 %v1064_v58 }
 0xca2   :  { %v2195_v41 = vpop.eup %2194 }
 0xca3   :  { %v2197_v6 = vpop.eup %2196  ;;  %v1044_v37 = vmul.f32 %v2195_v41, %v2706_v19 }
 0xca4   :  { %v1068_v63 = vmul.f32 %v2197_v6, %v2710_v3 }
 0xd02   :  { %v1047_v59 = vpop.permute.xlu0 %1046 }
 0xd03   :  { %v1049_v39 = vmul.f32 %v2195_v41, %v1047_v59 }
 0xd04   :  { %v1071_v60 = vpop.permute.xlu1 %1070 }
 0xd05   :  { %1051 = vrot.lane.b32.xlu0 %v1049_v39, %s2269_s6  ;;  %v1073_v61 = vmul.f32 %v2197_v6, %v1071_v60 }
 0xd07   :  { %1075 = vrot.lane.b32.xlu1 %v1073_v61, %s2269_s6 }
 0xd77   :  { %v1052_v62 = vpop.permute.xlu0 %1051 }
 0xd78   :  { %v2746_v44 = vadd.f32 %v1052_v62, %v1044_v37 }
 0xd79   :  { %v1076_v0 = vpop.permute.xlu1 %1075 }
 0xd7a   :  { %2198 = vtanh.f32 %v2746_v44  ;;  %v2750_v26 = vadd.f32 %v1076_v0, %v1068_v63 }
 0xd7c   :  { %2200 = vtanh.f32 %v2750_v26 }
 0xd87   :  { %v2199_v1 = vpop.eup %2198 }
 0xd88   :  { %1057 = vrot.lane.b32.xlu0 %v2199_v1, %s2269_s6 }
 0xd89   :  { %v2201_v48 = vpop.eup %2200 }
 0xd8a   :  { %1081 = vrot.lane.b32.xlu1 %v2201_v48, %s2269_s6 }
 0xdfa   :  { %v1058_v2 = vpop.permute.xlu0 %1057 }
 0xdfb   :  { %v1060_v19 = vmul.f32 %v2195_v41, %v1058_v2 }
 0xdfc   :  { %v1082_v52 = vpop.permute.xlu1 %1081 }
 0xdfd   :  { %1086 = vrot.lane.b32.xlu0 %v1060_v19, %s2270_s21  ;;  %v2756_v4 = vmul.f32 %v2197_v6, %v1082_v52 }
 0xdff   :  { %1097 = vrot.lane.b32.xlu1 %v2756_v4, %s2271_s22 }
 0xe6f   :  { %v1087_v3 = vpop.permute.xlu0 %1086 }
 0xe70   :  { %1090 = vst.msk [vmem:[#allocation4 + $0x20] sm:$0xff] %vm55_vm0, %v1087_v3 }
 0xe71   :  { %v1098_v7 = vpop.permute.xlu1 %1097 }
 0xe72   :  { %v1100_v8 = vsel %vm55_vm0, %v1087_v3, %v1098_v7 }
 0xe73   :  { %1979 = vmatmul.mubr.msk.f32.vlgmr.msra.gmra.mxu0 %vm385_vm1, %v1100_v8 }
 0xe74   :  { %1412 = vmatpush1.msra.mxu0 %v2361_v9  ;;  %1459 = vmatprep.mubr.f32.mxu0 %v2268_v34 }
 0xe75   :  { %1413 = vmatprep.subr.mxu0 %v2366_v10 }
 0xe76   :  { %1414 = vmatpush1.msra.mxu0 %v2373_v11 }
 0xe77   :  { %1415 = vmatprep.subr.mxu0 %v2383_v13 }
 0xe78   :  { %1416 = vmatpush1.msra.mxu0 %v2392_v15 }
 0xe79   :  { %1417 = vmatprep.subr.mxu0 %v2398_v16 }
 0xe7a   :  { %1418 = vmatpush1.msra.mxu0 %v2423_v21 }
 0xe7b   :  { %1419 = vmatprep.subr.mxu0 %v2432_v23 }
 0xe7c   :  { %1420 = vmatpush1.msra.mxu0 %v2441_v25 }
 0xe7d   :  { %1421 = vmatprep.subr.mxu0 %v2450_v27 }
 0xe7e   :  { %1422 = vmatpush1.msra.mxu0 %v2459_v29 }
 0xe7f   :  { %1423 = vmatprep.subr.mxu0 %v2468_v31 }
 0xe80   :  { %1424 = vmatpush1.msra.mxu0 %v2477_v33 }
 0xe81   :  { %1425 = vmatprep.subr.mxu0 %v2483_v35 }
 0xe82   :  { %1426 = vmatpush1.msra.mxu0 %v2489_v36 }
 0xf33   :  { %v1174_v9 = vpop.f32.mrf.mxu0 }
 0xf34   :  { %v1179_v10 = vadd.f32 %v1174_v9, %v2571_v46 }
 0xf35   :  { %v1176_v11 = vpop.f32.mrf.mxu0 }
 0xf36   :  { %2202 = vtanh.f32 %v1179_v10  ;;  %v1180_v13 = vadd.f32 %v1176_v11, %v2560_v30  ;;  %v1980_v21 = vmul.f32 -1.442695, %v1179_v10  ;;  %v2814_v11 = vld [vmem:[%s2986_s7 + $0x18] sm:$0xff] }
 0xf37   :  { %2087 = vmatprep.subr.mxu0 %v2814_v11 }
 0xf38   :  { %2204 = vtanh.f32 %v1180_v13  ;;  %v1981_v23 = vmul.f32 -1.442695, %v1180_v13 }
 0xf39   :  { %2206 = vpow2.f32 %v1980_v21 }
 0xf3a   :  { %2208 = vpow2.f32 %v1981_v23 }
 0xf43   :  { %v2203_v15 = vpop.eup %2202 }
 0xf44   :  { %1190 = vrot.lane.b32.xlu0 %v2203_v15, %s2269_s6 }
 0xf45   :  { %v2205_v16 = vpop.eup %2204 }
 0xf46   :  { %1214 = vrot.lane.b32.xlu1 %v2205_v16, %s2269_s6  ;;  %v2207_v25 = vpop.eup %2206 }
 0xf47   :  { %v2209_v27 = vpop.eup %2208  ;;  %v1184_v29 = vadd.f32 1.0, %v2207_v25 }
 0xf48   :  { %v1208_v31 = vadd.f32 1.0, %v2209_v27 }
 0xf49   :  { %2210 = vrcp.f32 %v1184_v29  ;;  %v2827_v29 = vld [vmem:[%s2986_s7 + $0x10] sm:$0xff] }
 0xf4a   :  { %2212 = vrcp.f32 %v1208_v31  ;;  %v1527_v31 = vld [vmem:[#allocation4] sm:$0xff] }
 0xf56   :  { %v2211_v33 = vpop.eup %2210 }
 0xf57   :  { %v2213_v36 = vpop.eup %2212  ;;  %v1188_v5 = vmul.f32 %v2211_v33, %v2746_v44 }
 0xf58   :  { %v1212_v38 = vmul.f32 %v2213_v36, %v2750_v26 }
 0xfb6   :  { %v1191_v34 = vpop.permute.xlu0 %1190 }
 0xfb7   :  { %v1193_v35 = vmul.f32 %v2211_v33, %v1191_v34  ;;  %v2842_v34 = vld [vmem:[%s2986_s7] sm:$0xff] }
 0xfb8   :  { %v1215_v30 = vpop.permute.xlu1 %1214 }
 0xfb9   :  { %1195 = vrot.lane.b32.xlu0 %v1193_v35, %s2269_s6  ;;  %v1217_v46 = vmul.f32 %v2213_v36, %v1215_v30  ;;  %v1528_v35 = vld [vmem:[#allocation4 + $0x8] sm:$0xff]  ;;  %v1530_v30 = vld [vmem:[#allocation4 + $0x18] sm:$0xff] }
 0xfbb   :  { %1219 = vrot.lane.b32.xlu1 %v1217_v46, %s2269_s6 }
0x102b   :  { %v1196_v20 = vpop.permute.xlu0 %1195 }
0x102c   :  { %v1198_v17 = vadd.f32 %v1196_v20, %v1188_v5 }
0x102d   :  { %v1220_v12 = vpop.permute.xlu1 %1219 }
0x102e   :  { %2214 = vtanh.f32 %v1198_v17  ;;  %v1222_v40 = vadd.f32 %v1220_v12, %v1212_v38 }
0x1030   :  { %2216 = vtanh.f32 %v1222_v40 }
0x103b   :  { %v2215_v24 = vpop.eup %2214 }
0x103c   :  { %1201 = vrot.lane.b32.xlu0 %v2215_v24, %s2269_s6 }
0x103d   :  { %v2217_v42 = vpop.eup %2216 }
0x103e   :  { %1225 = vrot.lane.b32.xlu1 %v2217_v42, %s2269_s6 }
0x10ae   :  { %v1202_v32 = vpop.permute.xlu0 %1201 }
0x10af   :  { %v1204_v47 = vmul.f32 %v2211_v33, %v1202_v32  ;;  %v2835_v33 = vld [vmem:[%s2986_s7 + $0x8] sm:$0xff] }
0x10b0   :  { %v1226_v49 = vpop.permute.xlu1 %1225 }
0x10b1   :  { %1230 = vrot.lane.b32.xlu0 %v1204_v47, %s2270_s21  ;;  %v2790_v51 = vmul.f32 %v2213_v36, %v1226_v49  ;;  %v1529_v36 = vld [vmem:[#allocation4 + $0x10] sm:$0xff] }
0x10b3   :  { %1241 = vrot.lane.b32.xlu1 %v2790_v51, %s2271_s22 }
0x1123   :  { %v1231_v53 = vpop.permute.xlu0 %1230 }
0x1124   :  { %1234 = vst.msk [vmem:[#allocation4 + $0x28] sm:$0xff] %vm55_vm0, %v1231_v53 }
0x1125   :  { %v1242_v55 = vpop.permute.xlu1 %1241 }
0x1126   :  { %v1244_v56 = vsel %vm55_vm0, %v1231_v53, %v1242_v55 }
0x1127   :  { %1982 = vmatmul.mubr.msk.f32.vlgmr.msra.gmra.mxu1 %vm385_vm1, %v1244_v56 }
0x11e7   :  { %v1318_v57 = vpop.f32.mrf.mxu1 }
0x11e8   :  { %v1323_v58 = vadd.f32 %v1318_v57, %v2575_v50 }
0x11e9   :  { %v1320_v41 = vpop.f32.mrf.mxu1 }
0x11ea   :  { %2218 = vtanh.f32 %v1323_v58  ;;  %v1324_v59 = vadd.f32 %v1320_v41, %v2556_v22  ;;  %v1983_v60 = vmul.f32 -1.442695, %v1323_v58 }
0x11ec   :  { %2220 = vtanh.f32 %v1324_v59  ;;  %v1984_v61 = vmul.f32 -1.442695, %v1324_v59 }
0x11ed   :  { %2222 = vpow2.f32 %v1983_v60 }
0x11ee   :  { %2224 = vpow2.f32 %v1984_v61 }
0x11f7   :  { %v2219_v39 = vpop.eup %2218 }
0x11f8   :  { %1334 = vrot.lane.b32.xlu0 %v2219_v39, %s2269_s6 }
0x11f9   :  { %v2221_v6 = vpop.eup %2220 }
0x11fa   :  { %1358 = vrot.lane.b32.xlu1 %v2221_v6, %s2269_s6  ;;  %v2223_v37 = vpop.eup %2222 }
0x11fb   :  { %v2225_v62 = vpop.eup %2224  ;;  %v1328_v44 = vadd.f32 1.0, %v2223_v37 }
0x11fc   :  { %v1352_v63 = vadd.f32 1.0, %v2225_v62  ;;  %v1550_v62 = vld [vmem:[%s2987_s8 + $0x18] sm:$0xff] }
0x11fd   :  { %2226 = vrcp.f32 %v1328_v44  ;;  %v1549_v44 = vld [vmem:[%s2987_s8 + $0x10] sm:$0xff]  ;;  %2067 = vmatprep.subr.mxu1 %v1550_v62 }
0x11fe   :  { %2228 = vrcp.f32 %v1352_v63  ;;  %2068 = vmatpush3.msra.mxu1 %v1550_v62  ;;  %v2007_v62 = vld [vmem:[%s2989_s1 + $0x20] sm:$0xff] }
0x11ff   :  { %2069 = vmatprep.subr.mxu1 %v1549_v44 }
0x1200   :  { %2070 = vmatpush3.msra.mxu1 %v1549_v44 }
0x120a   :  { %v2227_v50 = vpop.eup %2226 }
0x120b   :  { %v2229_v26 = vpop.eup %2228  ;;  %v1332_v2 = vmul.f32 %v2227_v50, %v1198_v17 }
0x120c   :  { %v1356_v3 = vmul.f32 %v2229_v26, %v1222_v40 }
0x126a   :  { %v1335_v0 = vpop.permute.xlu0 %1334 }
0x126b   :  { %v1337_v22 = vmul.f32 %v2227_v50, %v1335_v0 }
0x126c   :  { %v1359_v1 = vpop.permute.xlu1 %1358 }
0x126d   :  { %1339 = vrot.lane.b32.xlu0 %v1337_v22, %s2269_s6  ;;  %v1361_v48 = vmul.f32 %v2229_v26, %v1359_v1 }
0x126f   :  { %1363 = vrot.lane.b32.xlu1 %v1361_v48, %s2269_s6 }
0x12df   :  { %v1340_v19 = vpop.permute.xlu0 %1339 }
0x12e0   :  { %v2803_v52 = vadd.f32 %v1340_v19, %v1332_v2 }
0x12e1   :  { %v1364_v7 = vpop.permute.xlu1 %1363 }
0x12e2   :  { %2230 = vtanh.f32 %v2803_v52  ;;  %v2806_v8 = vadd.f32 %v1364_v7, %v1356_v3 }
0x12e4   :  { %2232 = vtanh.f32 %v2806_v8 }
0x12ef   :  { %v2231_v9 = vpop.eup %2230 }
0x12f0   :  { %1345 = vrot.lane.b32.xlu0 %v2231_v9, %s2269_s6 }
0x12f1   :  { %v2233_v10 = vpop.eup %2232 }
0x12f2   :  { %1369 = vrot.lane.b32.xlu1 %v2233_v10, %s2269_s6 }
0x1362   :  { %v1346_v13 = vpop.permute.xlu0 %1345 }
0x1363   :  { %v1348_v15 = vmul.f32 %v2227_v50, %v1346_v13 }
0x1364   :  { %v1370_v16 = vpop.permute.xlu1 %1369 }
0x1365   :  { %1374 = vrot.lane.b32.xlu0 %v1348_v15, %s2270_s21  ;;  %v2818_v21 = vmul.f32 %v2229_v26, %v1370_v16  ;;  %v1531_v15 = vld [vmem:[#allocation4 + $0x20] sm:$0xff]  ;;  %v1532_v16 = vld [vmem:[#allocation4 + $0x28] sm:$0xff] }
0x1367   :  { %1385 = vrot.lane.b32.xlu1 %v2818_v21, %s2271_s22 }
0x13d7   :  { %v1375_v23 = vpop.permute.xlu0 %1374 }
0x13d8   :  { %1378 = vst.msk [vmem:[#allocation4 + $0x30] sm:$0xff] %vm55_vm0, %v1375_v23 }
0x13d9   :  { %v1386_v25 = vpop.permute.xlu1 %1385 }
0x13da   :  { %v1388_v27 = vsel %vm55_vm0, %v1375_v23, %v1386_v25  ;;  %v2272_v25 = vmov 0  }
0x13db   :  { %1985 = vmatmul.mubr.msk.f32.vlgmr.msra.gmra.mxu0 %vm385_vm1, %v1388_v27  ;;  %2121 = vset.pattern.permute.xlu0 %v2272_v25 }
0x13dc   :  { %2088 = vmatpush3.msra.mxu0 %v2814_v11  ;;  %2095 = vmatprep.mubr.msk.f32.mxu0 %vm55_vm0, %v1527_v31 }
0x13dd   :  { %2089 = vmatprep.subr.mxu0 %v2827_v29  ;;  %2120 = vset.pattern.permute.xlu1 %v2272_v25 }
0x13de   :  { %2090 = vmatpush3.msra.mxu0 %v2827_v29 }
0x13df   :  { %2091 = vmatprep.subr.mxu0 %v2835_v33 }
0x13e0   :  { %2092 = vmatpush3.msra.mxu0 %v2835_v33 }
0x13e1   :  { %2093 = vmatprep.subr.mxu0 %v2842_v34 }
0x13e2   :  { %2094 = vmatpush3.msra.mxu0 %v2842_v34 }
0x13e3   :  { %2096 = vmatmul.mubr.msk.f32.vlgmr.msra.gmra.mxu0 %vm55_vm0, %v1528_v35 }
0x13e4   :  { %2098 = vmatprep.mubr.msk.f32.mxu0 %vm55_vm0, %v1529_v36 }
0x13e7   :  { %2099 = vmatmul.mubr.msk.f32.gmra.mxu0 %vm55_vm0, %v1530_v30 }
0x149b   :  { %v1461_v46 = vpop.f32.mrf.mxu0 }
0x149c   :  { %v1466_v5 = vadd.f32 %v1461_v46, %v2579_v54 }
0x149d   :  { %v1463_v20 = vpop.f32.mrf.mxu0 }
0x149e   :  { %2234 = vtanh.f32 %v1466_v5  ;;  %v1467_v17 = vadd.f32 %v1463_v20, %v2552_v14  ;;  %v1986_v40 = vmul.f32 -1.442695, %v1466_v5 }
0x14a0   :  { %2236 = vtanh.f32 %v1467_v17  ;;  %v1987_v24 = vmul.f32 -1.442695, %v1467_v17  ;;  %v1810_v17 = vstv %s2988_s9 }
0x14a1   :  { %2238 = vpow2.f32 %v1986_v40  ;;  %v1812_v40 = vld [vmem:[%s2989_s1] sm:$0xff] }
0x14a2   :  { %2240 = vpow2.f32 %v1987_v24 }
0x14a3   :  { %v2097_v27 = vpop.f32.mrf.mxu0 }
0x14ab   :  { %v2235_v38 = vpop.eup %2234 }
0x14ac   :  { %1477 = vrot.lane.b32.xlu1 %v2235_v38, %s2269_s6 }
0x14ad   :  { %v2237_v12 = vpop.eup %2236 }
0x14ae   :  { %1501 = vrot.lane.b32.xlu0 %v2237_v12, %s2269_s6  ;;  %v2239_v42 = vpop.eup %2238 }
0x14af   :  { %v2241_v32 = vpop.eup %2240  ;;  %v1471_v47 = vadd.f32 1.0, %v2239_v42 }
0x14b0   :  { %v1495_v49 = vadd.f32 1.0, %v2241_v32 }
0x14b1   :  { %2242 = vrcp.f32 %v1471_v47  ;;  %v2004_v47 = vld [vmem:[%s2989_s1 + $0x8] sm:$0xff] }
0x14b2   :  { %2244 = vrcp.f32 %v1495_v49  ;;  %v2005_v49 = vld [vmem:[%s2989_s1 + $0x10] sm:$0xff] }
0x14be   :  { %v2243_v54 = vpop.eup %2242 }
0x14bf   :  { %v2245_v55 = vpop.eup %2244  ;;  %v1475_v58 = vmul.f32 %v2243_v54, %v2803_v52 }
0x14c0   :  { %v1499_v39 = vmul.f32 %v2245_v55, %v2806_v8 }
0x151e   :  { %v1478_v53 = vpop.permute.xlu1 %1477 }
0x151f   :  { %v1480_v14 = vmul.f32 %v2243_v54, %v1478_v53 }
0x1520   :  { %v1502_v56 = vpop.permute.xlu0 %1501 }
0x1521   :  { %1482 = vrot.lane.b32.xlu1 %v1480_v14, %s2269_s6  ;;  %v1504_v57 = vmul.f32 %v2245_v55, %v1502_v56 }
0x1523   :  { %1506 = vrot.lane.b32.xlu0 %v1504_v57, %s2269_s6 }
0x1593   :  { %v1483_v41 = vpop.permute.xlu1 %1482 }
0x1594   :  { %v1485_v59 = vadd.f32 %v1483_v41, %v1475_v58 }
0x1595   :  { %v1507_v6 = vpop.permute.xlu0 %1506 }
0x1596   :  { %2246 = vtanh.f32 %v1485_v59  ;;  %v1509_v60 = vadd.f32 %v1507_v6, %v1499_v39  ;;  %v2006_v6 = vld [vmem:[%s2989_s1 + $0x18] sm:$0xff] }
0x1598   :  { %2248 = vtanh.f32 %v1509_v60 }
0x15a3   :  { %v2247_v61 = vpop.eup %2246 }
0x15a4   :  { %1488 = vrot.lane.b32.xlu1 %v2247_v61, %s2269_s6 }
0x15a5   :  { %v2249_v37 = vpop.eup %2248 }
0x15a6   :  { %1512 = vrot.lane.b32.xlu0 %v2249_v37, %s2269_s6 }
0x15a8   :  { %1380 = vrot.lane.b32.xlu1 %v2818_v21, %s2270_s21  ;;  %v1533_v21 = vld [vmem:[#allocation4 + $0x30] sm:$0xff] }
0x15ac   :  { %1092 = vrot.lane.b32.xlu1 %v2756_v4, %s2270_s21  ;;  %v1548_v4 = vld [vmem:[%s2987_s8 + $0x8] sm:$0xff] }
0x15ad   :  { %2071 = vmatprep.subr.mxu1 %v1548_v4 }
0x15ae   :  { %2072 = vmatpush3.msra.mxu1 %v1548_v4 }
0x15b0   :  { %804 = vrot.lane.b32.xlu1 %v2675_v18, %s2270_s21 }
0x15b4   :  { %516 = vrot.lane.b32.xlu1 %v2593_v45, %s2270_s21  ;;  %v1547_v45 = vld [vmem:[%s2987_s8] sm:$0xff] }
0x15b5   :  { %2073 = vmatprep.subr.mxu1 %v1547_v45 }
0x15b6   :  { %2074 = vmatpush3.msra.mxu1 %v1547_v45 }
0x15b7   :  { %2107 = vmatprep.subr.mxu1 %v2814_v11 }
0x1616   :  { %v1489_v18 = vpop.permute.xlu1 %1488 }
0x1617   :  { %v1491_v48 = vmul.f32 %v2243_v54, %v1489_v18 }
0x1618   :  { %v1513_v63 = vpop.permute.xlu0 %1512 }
0x1619   :  { %v1515_v50 = vmul.f32 %v2245_v55, %v1513_v63 }
0x161a   :  { %v1381_v0 = vpop.permute.xlu1 %1380 }
0x161b   :  { %1384 = vst.msk [vmem:[#allocation5 + $0x8] sm:$0xff] %vm55_vm0, %v1381_v0  ;;  %1523 = vrot.lane.b32.xlu0 %v1515_v50, %s2270_s21  ;;  %v2008_v50 = vld [vmem:[%s2989_s1 + $0x28] sm:$0xff] }
0x161e   :  { %v1093_v22 = vpop.permute.xlu1 %1092 }
0x161f   :  { %1096 = vst.msk [vmem:[#allocation5 + $0x18] sm:$0xff] %vm55_vm0, %v1093_v22  ;;  %1236 = vrot.lane.b32.xlu0 %v2790_v51, %s2270_s21 }
0x1622   :  { %v805_v26 = vpop.permute.xlu1 %804 }
0x1623   :  { %808 = vst.msk [vmem:[#allocation5 + $0x28] sm:$0xff] %vm55_vm0, %v805_v26  ;;  %948 = vrot.lane.b32.xlu0 %v2716_v28, %s2270_s21  ;;  %v1540_v28 = vld [vmem:[#allocation5 + $0x8] sm:$0xff] }
0x1626   :  { %v517_v1 = vpop.permute.xlu1 %516  ;;  %v1542_v7 = vld [vmem:[#allocation5 + $0x18] sm:$0xff] }
0x1627   :  { %520 = vst.msk [vmem:[#allocation5 + $0x38] sm:$0xff] %vm55_vm0, %v517_v1  ;;  %660 = vrot.lane.b32.xlu0 %v2634_v43, %s2270_s21 }
0x162a   :  { %v1544_v10 = vld [vmem:[#allocation5 + $0x28] sm:$0xff] }
0x162b   :  { %1517 = vrot.lane.b32.xlu0 %v1491_v48, %s2270_s21  ;;  %v2009_v48 = vld [vmem:[%s2989_s1 + $0x30] sm:$0xff] }
0x162e   :  { %v1546_v13 = vld [vmem:[#allocation5 + $0x38] sm:$0xff] }
0x168d   :  { %v1524_v2 = vpop.permute.xlu0 %1523 }
0x168e   :  { %1526 = vst.msk [vmem:[#allocation5] sm:$0xff] %vm55_vm0, %v1524_v2 }
0x1691   :  { %v1237_v19 = vpop.permute.xlu0 %1236 }
0x1692   :  { %1240 = vst.msk [vmem:[#allocation5 + $0x10] sm:$0xff] %vm55_vm0, %v1237_v19 }
0x1695   :  { %v949_v51 = vpop.permute.xlu0 %948  ;;  %v1539_v52 = vld [vmem:[#allocation5] sm:$0xff] }
0x1696   :  { %952 = vst.msk [vmem:[#allocation5 + $0x20] sm:$0xff] %vm55_vm0, %v949_v51  ;;  %2075 = vmatprep.mubr.msk.f32.mxu1 %vm55_vm0, %v1539_v52 }
0x1697   :  { %2076 = vmatmul.mubr.msk.f32.vlgmr.msra.gmra.mxu1 %vm55_vm0, %v1540_v28  ;;  %v2010_v28 = vld [vmem:[%s2989_s1 + $0x38] sm:$0xff] }
0x1698   :  { %2111 = vmatpush3.msra.mxu1 %v2814_v11 }
0x1699   :  { %v661_v43 = vpop.permute.xlu0 %660  ;;  %v1541_v3 = vld [vmem:[#allocation5 + $0x10] sm:$0xff]  ;;  %2108 = vmatprep.subr.mxu1 %v2827_v29 }
0x169a   :  { %664 = vst.msk [vmem:[#allocation5 + $0x30] sm:$0xff] %vm55_vm0, %v661_v43  ;;  %2078 = vmatprep.mubr.msk.f32.mxu1 %vm55_vm0, %v1541_v3  ;;  %2112 = vmatpush3.msra.mxu1 %v2827_v29  ;;  %v1770_v29 = vpop.f32.mrf.mxu0 }
0x169b   :  { %2079 = vmatmul.mubr.msk.f32.gmra.mxu1 %vm55_vm0, %v1542_v7  ;;  %2109 = vmatprep.subr.mxu1 %v2835_v33 }
0x169c   :  { %2113 = vmatpush3.msra.mxu1 %v2835_v33  ;;  %v2100_v33 = vpop.f32.mrf.mxu0 }
0x169d   :  { %v1518_v8 = vpop.permute.xlu0 %1517  ;;  %v1543_v9 = vld [vmem:[#allocation5 + $0x20] sm:$0xff]  ;;  %2110 = vmatprep.subr.mxu1 %v2842_v34 }
0x169e   :  { %1521 = vst.msk [vmem:[#allocation4 + $0x38] sm:$0xff] %vm55_vm0, %v1518_v8  ;;  %2081 = vmatprep.mubr.msk.f32.mxu1 %vm55_vm0, %v1543_v9  ;;  %2114 = vmatpush3.msra.mxu1 %v2842_v34  ;;  %v1780_v30 = vpop.f32.mrf.mxu0 }
0x169f   :  { %2082 = vmatmul.mubr.msk.f32.gmra.mxu1 %vm55_vm0, %v1544_v10 }
0x16a1   :  { %v1545_v11 = vld [vmem:[#allocation5 + $0x30] sm:$0xff] }
0x16a2   :  { %2084 = vmatprep.mubr.msk.f32.mxu1 %vm55_vm0, %v1545_v11 }
0x16a3   :  { %2085 = vmatmul.mubr.msk.f32.gmra.mxu1 %vm55_vm0, %v1546_v13 }
0x16a4   :  { %2101 = vmatprep.mubr.msk.f32.mxu1 %vm55_vm0, %v1531_v15 }
0x16a5   :  { %v1534_v23 = vld [vmem:[#allocation4 + $0x38] sm:$0xff] }
0x16a7   :  { %2102 = vmatmul.mubr.msk.f32.vlgmr.msra.gmra.mxu1 %vm55_vm0, %v1532_v16 }
0x16a8   :  { %2104 = vmatprep.mubr.msk.f32.mxu1 %vm55_vm0, %v1533_v21 }
0x16ab   :  { %2105 = vmatmul.mubr.msk.f32.gmra.mxu1 %vm55_vm0, %v1534_v23 }
0x1757   :  { %v2077_v31 = vpop.f32.mrf.mxu1 }
0x1758   :  { %v2920_v5 = vadd.f32 %v2097_v27, %v2077_v31 }
0x1759   :  { %v1641_v34 = vpop.f32.mrf.mxu1 }
0x175a   :  { %v2918_v36 = vadd.f32 %v1770_v29, %v1641_v34  ;;  %v1814_v42 = vadd.f32 %v1810_v17, %v2920_v5 }
0x175b   :  { %v2080_v35 = vpop.f32.mrf.mxu1 }
0x175c   :  { %v1811_v12 = vadd.f32 %v1810_v17, %v2918_v36  ;;  %v2939_v14 = vadd.f32 %v2100_v33, %v2080_v35  ;;  %v1817_v56 = vmul.f32 %v2004_v47, %v1814_v42 }
0x175d   :  { %v1651_v46 = vpop.f32.mrf.mxu1 }
0x175e   :  { %v2922_v20 = vadd.f32 %v1780_v30, %v1651_v46  ;;  %v1813_v53 = vmul.f32 %v1812_v40, %v1811_v12  ;;  %v1822_v59 = vadd.f32 %v1810_v17, %v2939_v14 }
0x175f   :  { %v2083_v38 = vpop.f32.mrf.mxu1 }
0x1760   :  { %v1818_v32 = vadd.f32 %v1810_v17, %v2922_v20  ;;  %v1842_v41 = vmax.f32 %v1813_v53, %v1817_v56  ;;  %v1825_v4 = vmul.f32 %v2006_v6, %v1822_v59 }
0x1761   :  { %v1661_v24 = vpop.f32.mrf.mxu1 }
0x1762   :  { %v1821_v57 = vmul.f32 %v2005_v49, %v1818_v32 }
0x1763   :  { %v2086_v54 = vpop.f32.mrf.mxu1 }
0x1764   :  { %v1843_v61 = vmax.f32 %v1842_v41, %v1821_v57 }
0x1765   :  { %v1671_v55 = vpop.f32.mrf.mxu1 }
0x1766   :  { %v1844_v26 = vmax.f32 %v1843_v61, %v1825_v4 }
0x1767   :  { %v2103_v58 = vpop.f32.mrf.mxu1 }
0x1768   :  { %v2942_v39 = vadd.f32 %v2103_v58, %v2083_v38 }
0x1769   :  { %v1790_v60 = vpop.f32.mrf.mxu1 }
0x176a   :  { %v2947_v37 = vadd.f32 %v1790_v60, %v1661_v24  ;;  %v1830_v45 = vadd.f32 %v1810_v17, %v2942_v39 }
0x176b   :  { %v2106_v44 = vpop.f32.mrf.mxu1 }
0x176c   :  { %v1826_v18 = vadd.f32 %v1810_v17, %v2947_v37  ;;  %v2954_v63 = vadd.f32 %v2106_v44, %v2086_v54  ;;  %v1833_v2 = vmul.f32 %v2008_v50, %v1830_v45 }
0x176d   :  { %v1800_v0 = vpop.f32.mrf.mxu1 }
0x176e   :  { %v1829_v22 = vmul.f32 %v2007_v62, %v1826_v18  ;;  %v2959_v1 = vadd.f32 %v1800_v0, %v1671_v55  ;;  %v1838_v51 = vadd.f32 %v1810_v17, %v2954_v63 }
0x1770   :  { %v1845_v19 = vmax.f32 %v1844_v26, %v1829_v22  ;;  %v1834_v52 = vadd.f32 %v1810_v17, %v2959_v1  ;;  %v1841_v7 = vmul.f32 %v2010_v28, %v1838_v51 }
0x1772   :  { %v1837_v43 = vmul.f32 %v2009_v48, %v1834_v52  ;;  %v1846_v3 = vmax.f32 %v1845_v19, %v1833_v2 }
0x1774   :  { %v1847_v8 = vmax.f32 %v1846_v3, %v1837_v43 }
0x1776   :  { %v1848_v9 = vmax.f32 %v1847_v8, %v1841_v7 }
0x1778   :  { %v1849_v10 = vsub.f32 %v1813_v53, %v1848_v9  ;;  %v1852_v11 = vsub.f32 %v1817_v56, %v1848_v9  ;;  %v1855_v13 = vsub.f32 %v1821_v57, %v1848_v9  ;;  %v1858_v15 = vsub.f32 %v1825_v4, %v1848_v9 }
0x1779   :  { %v1861_v16 = vsub.f32 %v1829_v22, %v1848_v9  ;;  %v1864_v29 = vsub.f32 %v1833_v2, %v1848_v9  ;;  %v1867_v33 = vsub.f32 %v1837_v43, %v1848_v9  ;;  %v1870_v30 = vsub.f32 %v1841_v7, %v1848_v9 }
0x177a   :  { %v1850_v21 = vmul.f32 1.442695, %v1849_v10  ;;  %v1853_v23 = vmul.f32 1.442695, %v1852_v11  ;;  %v1856_v25 = vmul.f32 1.442695, %v1855_v13 }
0x177b   :  { %v1859_v27 = vmul.f32 1.442695, %v1858_v15  ;;  %v1862_v31 = vmul.f32 1.442695, %v1861_v16  ;;  %v1865_v34 = vmul.f32 1.442695, %v1864_v29 }
0x177c   :  { %2250 = vpow2.f32 %v1850_v21  ;;  %v1868_v35 = vmul.f32 1.442695, %v1867_v33  ;;  %v1871_v46 = vmul.f32 1.442695, %v1870_v30 }
0x177d   :  { %2252 = vpow2.f32 %v1853_v23 }
0x177e   :  { %2254 = vpow2.f32 %v1856_v25 }
0x177f   :  { %2256 = vpow2.f32 %v1859_v27 }
0x1780   :  { %2258 = vpow2.f32 %v1862_v31 }
0x1781   :  { %2260 = vpow2.f32 %v1865_v34 }
0x1782   :  { %2262 = vpow2.f32 %v1868_v35 }
0x1783   :  { %2264 = vpow2.f32 %v1871_v46 }
0x1789   :  { %v2251_v17 = vpop.eup %2250 }
0x178a   :  { %v2253_v38 = vpop.eup %2252  ;;  %1882 = vperm.xlu1 %2120, %v2251_v17  }
0x178b   :  { %v1873_v12 = vadd.f32 %v2253_v38, %v2251_v17  ;;  %1888 = vperm.xlu0 %2121, %v2253_v38   ;;  %v2255_v40 = vpop.eup %2254 }
0x178c   :  { %v2257_v24 = vpop.eup %2256 }
0x178d   :  { %v1874_v42 = vadd.f32 %v2255_v40, %v1873_v12  ;;  %v2259_v32 = vpop.eup %2258 }
0x178e   :  { %1895 = vperm.xlu1 %2120, %v2255_v40   ;;  %v2261_v49 = vpop.eup %2260 }
0x178f   :  { %v1875_v47 = vadd.f32 %v2257_v24, %v1874_v42  ;;  %1909 = vperm.xlu0 %2121, %v2259_v32   ;;  %v2263_v53 = vpop.eup %2262 }
0x1790   :  { %v2265_v57 = vpop.eup %2264 }
0x1791   :  { %v1876_v54 = vadd.f32 %v2259_v32, %v1875_v47 }
0x1792   :  { %1902 = vperm.xlu1 %2120, %v2257_v24  }
0x1793   :  { %v1877_v55 = vadd.f32 %v2261_v49, %v1876_v54  ;;  %1923 = vperm.xlu0 %2121, %v2263_v53  }
0x1795   :  { %v1878_v56 = vadd.f32 %v2263_v53, %v1877_v55 }
0x1796   :  { %1916 = vperm.xlu1 %2120, %v2261_v49  }
0x1797   :  { %v1879_v58 = vadd.f32 %v2265_v57, %v1878_v56 }
0x1799   :  { %2266 = vrcp.f32 %v1879_v58 }
0x179a   :  { %1930 = vperm.xlu1 %2120, %v2265_v57  }
0x17a6   :  { %v2267_v41 = vpop.eup %2266 }
0x17a7   :  { %1939 = vperm.xlu0 %2121, %v2267_v41  }
0x1805   :  { %v1883_v59 = vpop.permute.xlu1 %1882 }
0x1806   :  { %v1889_v6 = vpop.permute.xlu0 %1888  ;;  %v1885_v61 = vmul.f32 %v1883_v59, %v2918_v36 }
0x1807   :  { %v1891_v60 = vmul.f32 %v1889_v6, %v2920_v5 }
0x1809   :  { %v1896_v62 = vpop.permute.xlu1 %1895  ;;  %v1892_v4 = vadd.f32 %v1891_v60, %v1885_v61 }
0x180a   :  { %v1898_v44 = vmul.f32 %v1896_v62, %v2922_v20  ;;  %v1910_v0 = vpop.permute.xlu0 %1909 }
0x180b   :  { %v1912_v48 = vmul.f32 %v1910_v0, %v2947_v37 }
0x180c   :  { %v1899_v50 = vadd.f32 %v1898_v44, %v1892_v4 }
0x180d   :  { %v1903_v45 = vpop.permute.xlu1 %1902 }
0x180e   :  { %v1905_v18 = vmul.f32 %v1903_v45, %v2939_v14  ;;  %v1924_v51 = vpop.permute.xlu0 %1923 }
0x180f   :  { %v1926_v36 = vmul.f32 %v1924_v51, %v2959_v1 }
0x1810   :  { %v1906_v22 = vadd.f32 %v1905_v18, %v1899_v50 }
0x1811   :  { %v1917_v26 = vpop.permute.xlu1 %1916 }
0x1812   :  { %v1913_v2 = vadd.f32 %v1912_v48, %v1906_v22  ;;  %v1919_v19 = vmul.f32 %v1917_v26, %v2942_v39 }
0x1814   :  { %v1920_v5 = vadd.f32 %v1919_v19, %v1913_v2 }
0x1815   :  { %v1931_v52 = vpop.permute.xlu1 %1930 }
0x1816   :  { %v1933_v20 = vmul.f32 %v1931_v52, %v2954_v63  ;;  %v1927_v28 = vadd.f32 %v1926_v36, %v1920_v5 }
0x1818   :  { %v1934_v43 = vadd.f32 %v1933_v20, %v1927_v28 }
0x1822   :  { %v1940_v3 = vpop.permute.xlu0 %1939 }
0x1823   :  { %v1942_v14 = vmul.f32 %v1940_v3, %v1934_v43 }
0x1825   :  { %1943 = vst [vmem:[%s2990_s10] sm:$0xff] %v1942_v14 }

</bundles_post_ra>
